<compile_context>
chip_gen: v7x
topology: tpu7x:2x2x1
jax: 0.10.0
libtpu: 0.0.40
codegen_flags: <defaults>
</compile_context>

<pallas_src>
import jax
import jax.numpy as jnp
from jax import lax
from jax.experimental import pallas as pl
from jax.experimental.pallas import tpu as pltpu


def _lstm_cnn_kernel(emb_ref,                      # (S*Bb, E)   time-major rows: t*Bb + b
                     w_in_ref, b_in_ref,           # (E, 9H), (1, 9H)
                     whh_f_ref, whh_b_ref,         # (H, 4H) each
                     w1f_ref, w1b_ref,             # (H, H) each
                     w2_ref, b2_ref,               # (H, P), (1, P)   P = lane-padded logits
                     out_ref,                      # (Bb, P)
                     xproj_ref,                    # scratch (S*Bb, 9H)
                     hfwd_ref, hbwd_ref):          # scratch (S*Bb, H) each
    H = whh_f_ref.shape[0]
    Bb = out_ref.shape[0]
    S = emb_ref.shape[0] // Bb

    # ---- 1) Hoist ALL input projections into one well-shaped matmul.
    #         columns [0:4H)  : forward-gate pre-activations   (bias folded)
    #         columns [4H:8H) : backward-gate pre-activations  (bias folded)
    #         columns [8H:9H) : fc1 embedding contribution     (b1 folded)
    xproj_ref[...] = (
        jnp.dot(emb_ref[...], w_in_ref[...], preferred_element_type=jnp.float32)
        + b_in_ref[...])

    whh_f = whh_f_ref[...]
    whh_b = whh_b_ref[...]

    def lstm_update(pre, c):
        # One full-width sigmoid + one full-width tanh (EUP pushes), then
        # static lane-aligned slices.  PyTorch gate order along 4H: i, f, g, o.
        sig = jax.nn.sigmoid(pre)
        th = jnp.tanh(pre)
        i_g = sig[:, 0:H]
        f_g = sig[:, H:2 * H]
        o_g = sig[:, 3 * H:4 * H]
        g_g = th[:, 2 * H:3 * H]
        c_new = f_g * c + i_g * g_g
        h_new = o_g * jnp.tanh(c_new)
        return h_new, c_new

    zero = jnp.zeros((Bb, H), jnp.float32)
    h_f, c_f = zero, zero
    h_b, c_b = zero, zero

    # ---- 2) Forward & backward recurrences interleaved, fully unrolled
    #         (S static & small): only h @ whh stays on the serial chain.
    for t in range(S):
        tb = S - 1 - t
        rf = slice(t * Bb, (t + 1) * Bb)
        rb = slice(tb * Bb, (tb + 1) * Bb)
        pre_f = xproj_ref[rf, 0:4 * H] + jnp.dot(
            h_f, whh_f, preferred_element_type=jnp.float32)
        pre_b = xproj_ref[rb, 4 * H:8 * H] + jnp.dot(
            h_b, whh_b, preferred_element_type=jnp.float32)
        h_f, c_f = lstm_update(pre_f, c_f)
        h_b, c_b = lstm_update(pre_b, c_b)
        hfwd_ref[rf, :] = h_f
        hbwd_ref[rb, :] = h_b

    # ---- 3) fc1 + tanh + max-pool over time, batched & off the serial loop.
    #         (emb @ w1e + b1 already sits in xproj columns [8H:9H).)
    z = jnp.tanh(
        xproj_ref[:, 8 * H:9 * H]
        + jnp.dot(hfwd_ref[...], w1f_ref[...], preferred_element_type=jnp.float32)
        + jnp.dot(hbwd_ref[...], w1b_ref[...], preferred_element_type=jnp.float32))

    pooled = z[0:Bb, :]
    for t in range(1, S):
        pooled = jnp.maximum(pooled, z[t * Bb:(t + 1) * Bb, :])

    # ---- 4) fc2 (lane-padded head -> dense store; wrapper slices real 2 cols).
    # TODO(synk): nn.Dropout is inference-identity; intentionally omitted.
    out_ref[...] = (
        jnp.dot(pooled, w2_ref[...], preferred_element_type=jnp.float32)
        + b2_ref[...])


def lstm_cnn_forward(token_ids, p, *, block_b=None, out_pad=128):
    """token_ids: (B, S) int32.  Returns (B, 2) float32 logits."""
    emb = jnp.take(p["embedding"], token_ids, axis=0).astype(jnp.float32)  # (B,S,E)
    B, S, E = emb.shape
    H = p["whh_f"].shape[0]

    if block_b is None:
        block_b = B if B <= 8 else 8          # >1 grid cell => 2nd TC on v7x
    assert B % block_b == 0
    nb = B // block_b

    # Time-major, batch-blocked, flattened to (nb, S*block_b, E) with
    # row index = t*block_b + local_b — exactly the layout the kernel consumes,
    # so no in-kernel reshapes are needed.
    emb_t = jnp.transpose(emb, (1, 0, 2))                       # (S, B, E)
    emb_t = emb_t.reshape(S, nb, block_b, E).transpose(1, 0, 2, 3)
    emb_t = emb_t.reshape(nb, S * block_b, E)

    # Pack ALL x-projections into one (E, 9H) matrix + fused (1, 9H) bias:
    #   [0:4H) fwd gates, [4H:8H) bwd gates, [8H:9H) fc1 embedding term.
    w_in = jnp.concatenate([p["wih_f"], p["wih_b"], p["w1e"]], axis=1)
    b_in = jnp.concatenate([p["b_f"], p["b_b"], p["b1"]], axis=1)

    # Lane-pad the 2-wide logits head so the final store is lane-dense.
    w2p = jnp.zeros((H, out_pad), jnp.float32).at[:, :2].set(p["w2"])
    b2p = jnp.zeros((1, out_pad), jnp.float32).at[:, :2].set(p["b2"])

    def full2d(a):
        return pl.BlockSpec(a.shape, lambda i: (0, 0))

    # NOTE(scaling): at real sizes, stream emb over an extra 'arbitrary' S-grid
    # axis (carry h/c in scratch) and/or raise vmem_limit_bytes — v7x has only
    # 64 MiB VMEM vs 128 MiB on v5e/v6e.
    out = pl.pallas_call(
        _lstm_cnn_kernel,
        out_shape=jax.ShapeDtypeStruct((B, out_pad), jnp.float32),
        grid=(nb,),
        in_specs=[
            pl.BlockSpec((None, S * block_b, E), lambda i: (i, 0, 0)),
            full2d(w_in), full2d(b_in),
            full2d(p["whh_f"]), full2d(p["whh_b"]),
            full2d(p["w1f"]), full2d(p["w1b"]),
            full2d(w2p), full2d(b2p),
        ],
        out_specs=pl.BlockSpec((block_b, out_pad), lambda i: (i, 0)),
        scratch_shapes=[
            pltpu.VMEM((S * block_b, 9 * H), jnp.float32),
            pltpu.VMEM((S * block_b, H), jnp.float32),
            pltpu.VMEM((S * block_b, H), jnp.float32),
        ],
        compiler_params=pltpu.CompilerParams(
            dimension_semantics=("parallel",)),
    )(emb_t, w_in, b_in,
      p["whh_f"], p["whh_b"], p["w1f"], p["w1b"], w2p, b2p)

    return out[:, :2]


def init_params(key, vocab, emb_dim, hidden):
    """Deterministic synthetic parameters with PyTorch-module shapes,
    repacked into the layout the kernel expects."""
    ks = jax.random.split(key, 16)

    def u(k, shape, scale):
        return jax.random.uniform(k, shape, jnp.float32, -scale, scale)

    E, H = emb_dim, hidden
    embedding = jax.random.normal(ks[0], (vocab, E), jnp.float32) * 0.1

    s = 1.0 / float(H) ** 0.5
    # nn.LSTM(E, H, bidirectional=True): per direction weight_ih (4H,E),
    # weight_hh (4H,H), bias_ih (4H,), bias_hh (4H,)
    wih_f = u(ks[1], (4 * H, E), s); whh_f = u(ks[2], (4 * H, H), s)
    bih_f = u(ks[3], (4 * H,), s);   bhh_f = u(ks[4], (4 * H,), s)
    wih_b = u(ks[5], (4 * H, E), s); whh_b = u(ks[6], (4 * H, H), s)
    bih_b = u(ks[7], (4 * H,), s);   bhh_b = u(ks[8], (4 * H,), s)

    s1 = 1.0 / float(E + 2 * H) ** 0.5
    w1 = u(ks[9], (H, E + 2 * H), s1)   # nn.Linear(E + 2H, H)
    b1 = u(ks[10], (H,), s1)
    s2 = 1.0 / float(H) ** 0.5
    w2 = u(ks[11], (2, H), s2)          # nn.Linear(H, 2)
    b2 = u(ks[12], (2,), s2)

    return {
        "embedding": embedding,
        # forward direction, pre-transposed, biases fused
        "wih_f": wih_f.T, "whh_f": whh_f.T, "b_f": (bih_f + bhh_f).reshape(1, 4 * H),
        # backward direction
        "wih_b": wih_b.T, "whh_b": whh_b.T, "b_b": (bih_b + bhh_b).reshape(1, 4 * H),
        # fc1 split according to cat order (h_fwd, emb, h_bwd)
        "w1f": w1[:, 0:H].T, "w1e": w1[:, H:H + E].T, "w1b": w1[:, H + E:].T,
        "b1": b1.reshape(1, H),
        "w2": w2.T, "b2": b2.reshape(1, 2),
    }


def reference_forward(token_ids, p):
    """Pure-JAX reference mirroring the PyTorch forward (eval mode)."""
    emb = jnp.take(p["embedding"], token_ids, axis=0)      # (B, S, E)
    emb = jnp.transpose(emb, (1, 0, 2))                    # (S, B, E)
    S, B, E = emb.shape
    H = p["whh_f"].shape[0]

    def cell(wih, whh, b):
        def step(carry, x_t):
            h, c = carry
            g = x_t @ wih + h @ whh + b
            i = jax.nn.sigmoid(g[:, 0:H]); f = jax.nn.sigmoid(g[:, H:2 * H])
            gg = jnp.tanh(g[:, 2 * H:3 * H]); o = jax.nn.sigmoid(g[:, 3 * H:4 * H])
            c = f * c + i * gg
            h = o * jnp.tanh(c)
            return (h, c), h
        return step

    h0 = jnp.zeros((B, H), jnp.float32); c0 = jnp.zeros((B, H), jnp.float32)
    _, h_fwd = lax.scan(cell(p["wih_f"], p["whh_f"], p["b_f"]), (h0, c0), emb)
    _, h_bwd = lax.scan(cell(p["wih_b"], p["whh_b"], p["b_b"]), (h0, c0), emb[::-1])
    h_bwd = h_bwd[::-1]

    z = jnp.tanh(h_fwd @ p["w1f"] + emb @ p["w1e"] + h_bwd @ p["w1b"] + p["b1"])
    pooled = jnp.max(z, axis=0)                            # max over seq -> (B, H)
    return pooled @ p["w2"] + p["b2"]


if __name__ == "__main__":
    VOCAB, EMB, HIDDEN = 50, 32, 32
    BATCH, SEQ = 2, 8

    key = jax.random.PRNGKey(0)
    kp, kx = jax.random.split(key)
    params = init_params(kp, VOCAB, EMB, HIDDEN)
    token_ids = jax.random.randint(kx, (BATCH, SEQ), 0, VOCAB, dtype=jnp.int32)

    out = lstm_cnn_forward(token_ids, params)
    out = jax.block_until_ready(out)

    ref = jax.block_until_ready(reference_forward(token_ids, params))
    assert out.shape == (BATCH, 2)
    assert bool(jnp.all(jnp.isfinite(out)))
    assert bool(jnp.allclose(out, ref, atol=1e-3, rtol=1e-3)), (out, ref)

    print("KERNEL_OK")
</pallas_src>

<mosaic_0001>
module attributes {stable_mosaic.version = 11 : i64} {
  func.func @_lstm_cnn_kernel(%arg0: i32, %arg1: memref<1x16x32xf32, #tpu.memory_space<vmem>>, %arg2: memref<32x288xf32, #tpu.memory_space<vmem>>, %arg3: memref<1x288xf32, #tpu.memory_space<vmem>>, %arg4: memref<32x128xf32, #tpu.memory_space<vmem>>, %arg5: memref<32x128xf32, #tpu.memory_space<vmem>>, %arg6: memref<32x32xf32, #tpu.memory_space<vmem>>, %arg7: memref<32x32xf32, #tpu.memory_space<vmem>>, %arg8: memref<32x128xf32, #tpu.memory_space<vmem>>, %arg9: memref<1x128xf32, #tpu.memory_space<vmem>>, %arg10: memref<2x128xf32, #tpu.memory_space<vmem>>, %arg11: memref<16x288xf32, #tpu.memory_space<vmem>>, %arg12: memref<16x32xf32, #tpu.memory_space<vmem>>, %arg13: memref<16x32xf32, #tpu.memory_space<vmem>>) attributes {dimension_semantics = [#tpu.dimension_semantics<parallel>], iteration_bounds = array<i64: 1>, scalar_prefetch = 0 : i64, scratch_operands = 3 : i64, tpu.core_type = #tpu.core_type<tc>, window_params = [{transform_indices = @transform_0, window_bounds = array<i64: 1, 16, 32>}, {pipeline_mode = #tpu.pipeline_mode<synchronous>, transform_indices = @transform_1, window_bounds = array<i64: 32, 288>}, {pipeline_mode = #tpu.pipeline_mode<synchronous>, transform_indices = @transform_2, window_bounds = array<i64: 1, 288>}, {pipeline_mode = #tpu.pipeline_mode<synchronous>, transform_indices = @transform_3, window_bounds = array<i64: 32, 128>}, {pipeline_mode = #tpu.pipeline_mode<synchronous>, transform_indices = @transform_4, window_bounds = array<i64: 32, 128>}, {pipeline_mode = #tpu.pipeline_mode<synchronous>, transform_indices = @transform_5, window_bounds = array<i64: 32, 32>}, {pipeline_mode = #tpu.pipeline_mode<synchronous>, transform_indices = @transform_6, window_bounds = array<i64: 32, 32>}, {pipeline_mode = #tpu.pipeline_mode<synchronous>, transform_indices = @transform_7, window_bounds = array<i64: 32, 128>}, {pipeline_mode = #tpu.pipeline_mode<synchronous>, transform_indices = @transform_8, window_bounds = array<i64: 1, 128>}, {transform_indices = @transform_9, window_bounds = array<i64: 2, 128>}]} {
    %c0 = arith.constant 0 : index
    %c0_0 = arith.constant 0 : index
    %c0_1 = arith.constant 0 : index
    %0 = vector.load %arg1[%c0, %c0_0, %c0_1] : memref<1x16x32xf32, #tpu.memory_space<vmem>>, vector<1x16x32xf32>
    %1 = vector.shape_cast %0 : vector<1x16x32xf32> to vector<16x32xf32>
    %c0_2 = arith.constant 0 : index
    %c0_3 = arith.constant 0 : index
    %2 = vector.load %arg2[%c0_2, %c0_3] : memref<32x288xf32, #tpu.memory_space<vmem>>, vector<32x288xf32>
    %cst = arith.constant dense<0.000000e+00> : vector<16x288xf32>
    %3 = tpu.matmul %1, %2, %cst {dimension_numbers = #tpu.dot_dimension_numbers<[1], [0], [0], [1], [0, 0, 1, 1], [], []>} : vector<16x32xf32>, vector<32x288xf32>, vector<16x288xf32> -> vector<16x288xf32>
    %c0_4 = arith.constant 0 : index
    %c0_5 = arith.constant 0 : index
    %4 = vector.load %arg3[%c0_4, %c0_5] : memref<1x288xf32, #tpu.memory_space<vmem>>, vector<1x288xf32>
    %5 = vector.broadcast %4 : vector<1x288xf32> to vector<16x288xf32>
    %6 = arith.addf %3, %5 : vector<16x288xf32>
    %c0_6 = arith.constant 0 : index
    %c0_7 = arith.constant 0 : index
    %7 = vector.load %arg11[%c0_6, %c0_7] : memref<16x288xf32, #tpu.memory_space<vmem>>, vector<16x288xf32>
    tpu.vector_store %arg11[%c0_6, %c0_7], %6 {strides = array<i32>} : memref<16x288xf32, #tpu.memory_space<vmem>>, vector<16x288xf32>,
    %c0_8 = arith.constant 0 : index
    %c0_9 = arith.constant 0 : index
    %8 = vector.load %arg4[%c0_8, %c0_9] : memref<32x128xf32, #tpu.memory_space<vmem>>, vector<32x128xf32>
    %c0_10 = arith.constant 0 : index
    %c0_11 = arith.constant 0 : index
    %9 = vector.load %arg5[%c0_10, %c0_11] : memref<32x128xf32, #tpu.memory_space<vmem>>, vector<32x128xf32>
    %cst_12 = arith.constant 0.000000e+00 : f32
    %10 = vector.broadcast %cst_12 : f32 to vector<2x32xf32>
    %c0_13 = arith.constant 0 : index
    %c0_14 = arith.constant 0 : index
    %11 = vector.load %arg11[%c0_13, %c0_14] : memref<16x288xf32, #tpu.memory_space<vmem>>, vector<2x128xf32>
    %cst_15 = arith.constant dense<0.000000e+00> : vector<2x128xf32>
    %12 = tpu.matmul %10, %8, %cst_15 {dimension_numbers = #tpu.dot_dimension_numbers<[1], [0], [0], [1], [0, 0, 1, 1], [], []>} : vector<2x32xf32>, vector<32x128xf32>, vector<2x128xf32> -> vector<2x128xf32>
    %13 = arith.addf %11, %12 : vector<2x128xf32>
    %c14 = arith.constant 14 : index
    %c128 = arith.constant 128 : index
    %14 = vector.load %arg11[%c14, %c128] : memref<16x288xf32, #tpu.memory_space<vmem>>, vector<2x128xf32>
    %cst_16 = arith.constant dense<0.000000e+00> : vector<2x128xf32>
    %15 = tpu.matmul %10, %9, %cst_16 {dimension_numbers = #tpu.dot_dimension_numbers<[1], [0], [0], [1], [0, 0, 1, 1], [], []>} : vector<2x32xf32>, vector<32x128xf32>, vector<2x128xf32> -> vector<2x128xf32>
    %16 = arith.addf %14, %15 : vector<2x128xf32>
    %17 = arith.negf %13 : vector<2x128xf32>
    %18 = math.exp %17 : vector<2x128xf32>
    %cst_17 = arith.constant 1.000000e+00 : f32
    %19 = vector.broadcast %cst_17 : f32 to vector<2x128xf32>
    %20 = arith.addf %19, %18 : vector<2x128xf32>
    %21 = arith.divf %19, %20 : vector<2x128xf32>
    %22 = math.tanh %13 : vector<2x128xf32>
    %23 = vector.extract_strided_slice %21 {offsets = [0, 0], sizes = [2, 32], strides = [1, 1]} : vector<2x128xf32> to vector<2x32xf32>
    %24 = vector.extract_strided_slice %21 {offsets = [0, 32], sizes = [2, 32], strides = [1, 1]} : vector<2x128xf32> to vector<2x32xf32>
    %25 = vector.extract_strided_slice %21 {offsets = [0, 96], sizes = [2, 32], strides = [1, 1]} : vector<2x128xf32> to vector<2x32xf32>
    %26 = vector.extract_strided_slice %22 {offsets = [0, 64], sizes = [2, 32], strides = [1, 1]} : vector<2x128xf32> to vector<2x32xf32>
    %27 = arith.mulf %24, %10 : vector<2x32xf32>
    %28 = arith.mulf %23, %26 : vector<2x32xf32>
    %29 = arith.addf %27, %28 : vector<2x32xf32>
    %30 = math.tanh %29 : vector<2x32xf32>
    %31 = arith.mulf %25, %30 : vector<2x32xf32>
    %32 = arith.negf %16 : vector<2x128xf32>
    %33 = math.exp %32 : vector<2x128xf32>
    %cst_18 = arith.constant 1.000000e+00 : f32
    %34 = vector.broadcast %cst_18 : f32 to vector<2x128xf32>
    %35 = arith.addf %34, %33 : vector<2x128xf32>
    %36 = arith.divf %34, %35 : vector<2x128xf32>
    %37 = math.tanh %16 : vector<2x128xf32>
    %38 = vector.extract_strided_slice %36 {offsets = [0, 0], sizes = [2, 32], strides = [1, 1]} : vector<2x128xf32> to vector<2x32xf32>
    %39 = vector.extract_strided_slice %36 {offsets = [0, 32], sizes = [2, 32], strides = [1, 1]} : vector<2x128xf32> to vector<2x32xf32>
    %40 = vector.extract_strided_slice %36 {offsets = [0, 96], sizes = [2, 32], strides = [1, 1]} : vector<2x128xf32> to vector<2x32xf32>
    %41 = vector.extract_strided_slice %37 {offsets = [0, 64], sizes = [2, 32], strides = [1, 1]} : vector<2x128xf32> to vector<2x32xf32>
    %42 = arith.mulf %39, %10 : vector<2x32xf32>
    %43 = arith.mulf %38, %41 : vector<2x32xf32>
    %44 = arith.addf %42, %43 : vector<2x32xf32>
    %45 = math.tanh %44 : vector<2x32xf32>
    %46 = arith.mulf %40, %45 : vector<2x32xf32>
    %c0_19 = arith.constant 0 : index
    %c0_20 = arith.constant 0 : index
    %47 = vector.load %arg12[%c0_19, %c0_20] : memref<16x32xf32, #tpu.memory_space<vmem>>, vector<2x32xf32>
    tpu.vector_store %arg12[%c0_19, %c0_20], %31 {strides = array<i32>} : memref<16x32xf32, #tpu.memory_space<vmem>>, vector<2x32xf32>,
    %c14_21 = arith.constant 14 : index
    %c0_22 = arith.constant 0 : index
    %48 = vector.load %arg13[%c14_21, %c0_22] : memref<16x32xf32, #tpu.memory_space<vmem>>, vector<2x32xf32>
    tpu.vector_store %arg13[%c14_21, %c0_22], %46 {strides = array<i32>} : memref<16x32xf32, #tpu.memory_space<vmem>>, vector<2x32xf32>,
    %c2 = arith.constant 2 : index
    %c0_23 = arith.constant 0 : index
    %49 = vector.load %arg11[%c2, %c0_23] : memref<16x288xf32, #tpu.memory_space<vmem>>, vector<2x128xf32>
    %cst_24 = arith.constant dense<0.000000e+00> : vector<2x128xf32>
    %50 = tpu.matmul %31, %8, %cst_24 {dimension_numbers = #tpu.dot_dimension_numbers<[1], [0], [0], [1], [0, 0, 1, 1], [], []>} : vector<2x32xf32>, vector<32x128xf32>, vector<2x128xf32> -> vector<2x128xf32>
    %51 = arith.addf %49, %50 : vector<2x128xf32>
    %c12 = arith.constant 12 : index
    %c128_25 = arith.constant 128 : index
    %52 = vector.load %arg11[%c12, %c128_25] : memref<16x288xf32, #tpu.memory_space<vmem>>, vector<2x128xf32>
    %cst_26 = arith.constant dense<0.000000e+00> : vector<2x128xf32>
    %53 = tpu.matmul %46, %9, %cst_26 {dimension_numbers = #tpu.dot_dimension_numbers<[1], [0], [0], [1], [0, 0, 1, 1], [], []>} : vector<2x32xf32>, vector<32x128xf32>, vector<2x128xf32> -> vector<2x128xf32>
    %54 = arith.addf %52, %53 : vector<2x128xf32>
    %55 = arith.negf %51 : vector<2x128xf32>
    %56 = math.exp %55 : vector<2x128xf32>
    %cst_27 = arith.constant 1.000000e+00 : f32
    %57 = vector.broadcast %cst_27 : f32 to vector<2x128xf32>
    %58 = arith.addf %57, %56 : vector<2x128xf32>
    %59 = arith.divf %57, %58 : vector<2x128xf32>
    %60 = math.tanh %51 : vector<2x128xf32>
    %61 = vector.extract_strided_slice %59 {offsets = [0, 0], sizes = [2, 32], strides = [1, 1]} : vector<2x128xf32> to vector<2x32xf32>
    %62 = vector.extract_strided_slice %59 {offsets = [0, 32], sizes = [2, 32], strides = [1, 1]} : vector<2x128xf32> to vector<2x32xf32>
    %63 = vector.extract_strided_slice %59 {offsets = [0, 96], sizes = [2, 32], strides = [1, 1]} : vector<2x128xf32> to vector<2x32xf32>
    %64 = vector.extract_strided_slice %60 {offsets = [0, 64], sizes = [2, 32], strides = [1, 1]} : vector<2x128xf32> to vector<2x32xf32>
    %65 = arith.mulf %62, %29 : vector<2x32xf32>
    %66 = arith.mulf %61, %64 : vector<2x32xf32>
    %67 = arith.addf %65, %66 : vector<2x32xf32>
    %68 = math.tanh %67 : vector<2x32xf32>
    %69 = arith.mulf %63, %68 : vector<2x32xf32>
    %70 = arith.negf %54 : vector<2x128xf32>
    %71 = math.exp %70 : vector<2x128xf32>
    %cst_28 = arith.constant 1.000000e+00 : f32
    %72 = vector.broadcast %cst_28 : f32 to vector<2x128xf32>
    %73 = arith.addf %72, %71 : vector<2x128xf32>
    %74 = arith.divf %72, %73 : vector<2x128xf32>
    %75 = math.tanh %54 : vector<2x128xf32>
    %76 = vector.extract_strided_slice %74 {offsets = [0, 0], sizes = [2, 32], strides = [1, 1]} : vector<2x128xf32> to vector<2x32xf32>
    %77 = vector.extract_strided_slice %74 {offsets = [0, 32], sizes = [2, 32], strides = [1, 1]} : vector<2x128xf32> to vector<2x32xf32>
    %78 = vector.extract_strided_slice %74 {offsets = [0, 96], sizes = [2, 32], strides = [1, 1]} : vector<2x128xf32> to vector<2x32xf32>
    %79 = vector.extract_strided_slice %75 {offsets = [0, 64], sizes = [2, 32], strides = [1, 1]} : vector<2x128xf32> to vector<2x32xf32>
    %80 = arith.mulf %77, %44 : vector<2x32xf32>
    %81 = arith.mulf %76, %79 : vector<2x32xf32>
    %82 = arith.addf %80, %81 : vector<2x32xf32>
    %83 = math.tanh %82 : vector<2x32xf32>
    %84 = arith.mulf %78, %83 : vector<2x32xf32>
    %c2_29 = arith.constant 2 : index
    %c0_30 = arith.constant 0 : index
    %85 = vector.load %arg12[%c2_29, %c0_30] : memref<16x32xf32, #tpu.memory_space<vmem>>, vector<2x32xf32>
    tpu.vector_store %arg12[%c2_29, %c0_30], %69 {strides = array<i32>} : memref<16x32xf32, #tpu.memory_space<vmem>>, vector<2x32xf32>,
    %c12_31 = arith.constant 12 : index
    %c0_32 = arith.constant 0 : index
    %86 = vector.load %arg13[%c12_31, %c0_32] : memref<16x32xf32, #tpu.memory_space<vmem>>, vector<2x32xf32>
    tpu.vector_store %arg13[%c12_31, %c0_32], %84 {strides = array<i32>} : memref<16x32xf32, #tpu.memory_space<vmem>>, vector<2x32xf32>,
    %c4 = arith.constant 4 : index
    %c0_33 = arith.constant 0 : index
    %87 = vector.load %arg11[%c4, %c0_33] : memref<16x288xf32, #tpu.memory_space<vmem>>, vector<2x128xf32>
    %cst_34 = arith.constant dense<0.000000e+00> : vector<2x128xf32>
    %88 = tpu.matmul %69, %8, %cst_34 {dimension_numbers = #tpu.dot_dimension_numbers<[1], [0], [0], [1], [0, 0, 1, 1], [], []>} : vector<2x32xf32>, vector<32x128xf32>, vector<2x128xf32> -> vector<2x128xf32>
    %89 = arith.addf %87, %88 : vector<2x128xf32>
    %c10 = arith.constant 10 : index
    %c128_35 = arith.constant 128 : index
    %90 = vector.load %arg11[%c10, %c128_35] : memref<16x288xf32, #tpu.memory_space<vmem>>, vector<2x128xf32>
    %cst_36 = arith.constant dense<0.000000e+00> : vector<2x128xf32>
    %91 = tpu.matmul %84, %9, %cst_36 {dimension_numbers = #tpu.dot_dimension_numbers<[1], [0], [0], [1], [0, 0, 1, 1], [], []>} : vector<2x32xf32>, vector<32x128xf32>, vector<2x128xf32> -> vector<2x128xf32>
    %92 = arith.addf %90, %91 : vector<2x128xf32>
    %93 = arith.negf %89 : vector<2x128xf32>
    %94 = math.exp %93 : vector<2x128xf32>
    %cst_37 = arith.constant 1.000000e+00 : f32
    %95 = vector.broadcast %cst_37 : f32 to vector<2x128xf32>
    %96 = arith.addf %95, %94 : vector<2x128xf32>
    %97 = arith.divf %95, %96 : vector<2x128xf32>
    %98 = math.tanh %89 : vector<2x128xf32>
    %99 = vector.extract_strided_slice %97 {offsets = [0, 0], sizes = [2, 32], strides = [1, 1]} : vector<2x128xf32> to vector<2x32xf32>
    %100 = vector.extract_strided_slice %97 {offsets = [0, 32], sizes = [2, 32], strides = [1, 1]} : vector<2x128xf32> to vector<2x32xf32>
    %101 = vector.extract_strided_slice %97 {offsets = [0, 96], sizes = [2, 32], strides = [1, 1]} : vector<2x128xf32> to vector<2x32xf32>
    %102 = vector.extract_strided_slice %98 {offsets = [0, 64], sizes = [2, 32], strides = [1, 1]} : vector<2x128xf32> to vector<2x32xf32>
    %103 = arith.mulf %100, %67 : vector<2x32xf32>
    %104 = arith.mulf %99, %102 : vector<2x32xf32>
    %105 = arith.addf %103, %104 : vector<2x32xf32>
    %106 = math.tanh %105 : vector<2x32xf32>
    %107 = arith.mulf %101, %106 : vector<2x32xf32>
    %108 = arith.negf %92 : vector<2x128xf32>
    %109 = math.exp %108 : vector<2x128xf32>
    %cst_38 = arith.constant 1.000000e+00 : f32
    %110 = vector.broadcast %cst_38 : f32 to vector<2x128xf32>
    %111 = arith.addf %110, %109 : vector<2x128xf32>
    %112 = arith.divf %110, %111 : vector<2x128xf32>
    %113 = math.tanh %92 : vector<2x128xf32>
    %114 = vector.extract_strided_slice %112 {offsets = [0, 0], sizes = [2, 32], strides = [1, 1]} : vector<2x128xf32> to vector<2x32xf32>
    %115 = vector.extract_strided_slice %112 {offsets = [0, 32], sizes = [2, 32], strides = [1, 1]} : vector<2x128xf32> to vector<2x32xf32>
    %116 = vector.extract_strided_slice %112 {offsets = [0, 96], sizes = [2, 32], strides = [1, 1]} : vector<2x128xf32> to vector<2x32xf32>
    %117 = vector.extract_strided_slice %113 {offsets = [0, 64], sizes = [2, 32], strides = [1, 1]} : vector<2x128xf32> to vector<2x32xf32>
    %118 = arith.mulf %115, %82 : vector<2x32xf32>
    %119 = arith.mulf %114, %117 : vector<2x32xf32>
    %120 = arith.addf %118, %119 : vector<2x32xf32>
    %121 = math.tanh %120 : vector<2x32xf32>
    %122 = arith.mulf %116, %121 : vector<2x32xf32>
    %c4_39 = arith.constant 4 : index
    %c0_40 = arith.constant 0 : index
    %123 = vector.load %arg12[%c4_39, %c0_40] : memref<16x32xf32, #tpu.memory_space<vmem>>, vector<2x32xf32>
    tpu.vector_store %arg12[%c4_39, %c0_40], %107 {strides = array<i32>} : memref<16x32xf32, #tpu.memory_space<vmem>>, vector<2x32xf32>,
    %c10_41 = arith.constant 10 : index
    %c0_42 = arith.constant 0 : index
    %124 = vector.load %arg13[%c10_41, %c0_42] : memref<16x32xf32, #tpu.memory_space<vmem>>, vector<2x32xf32>
    tpu.vector_store %arg13[%c10_41, %c0_42], %122 {strides = array<i32>} : memref<16x32xf32, #tpu.memory_space<vmem>>, vector<2x32xf32>,
    %c6 = arith.constant 6 : index
    %c0_43 = arith.constant 0 : index
    %125 = vector.load %arg11[%c6, %c0_43] : memref<16x288xf32, #tpu.memory_space<vmem>>, vector<2x128xf32>
    %cst_44 = arith.constant dense<0.000000e+00> : vector<2x128xf32>
    %126 = tpu.matmul %107, %8, %cst_44 {dimension_numbers = #tpu.dot_dimension_numbers<[1], [0], [0], [1], [0, 0, 1, 1], [], []>} : vector<2x32xf32>, vector<32x128xf32>, vector<2x128xf32> -> vector<2x128xf32>
    %127 = arith.addf %125, %126 : vector<2x128xf32>
    %c8 = arith.constant 8 : index
    %c128_45 = arith.constant 128 : index
    %128 = vector.load %arg11[%c8, %c128_45] : memref<16x288xf32, #tpu.memory_space<vmem>>, vector<2x128xf32>
    %cst_46 = arith.constant dense<0.000000e+00> : vector<2x128xf32>
    %129 = tpu.matmul %122, %9, %cst_46 {dimension_numbers = #tpu.dot_dimension_numbers<[1], [0], [0], [1], [0, 0, 1, 1], [], []>} : vector<2x32xf32>, vector<32x128xf32>, vector<2x128xf32> -> vector<2x128xf32>
    %130 = arith.addf %128, %129 : vector<2x128xf32>
    %131 = arith.negf %127 : vector<2x128xf32>
    %132 = math.exp %131 : vector<2x128xf32>
    %cst_47 = arith.constant 1.000000e+00 : f32
    %133 = vector.broadcast %cst_47 : f32 to vector<2x128xf32>
    %134 = arith.addf %133, %132 : vector<2x128xf32>
    %135 = arith.divf %133, %134 : vector<2x128xf32>
    %136 = math.tanh %127 : vector<2x128xf32>
    %137 = vector.extract_strided_slice %135 {offsets = [0, 0], sizes = [2, 32], strides = [1, 1]} : vector<2x128xf32> to vector<2x32xf32>
    %138 = vector.extract_strided_slice %135 {offsets = [0, 32], sizes = [2, 32], strides = [1, 1]} : vector<2x128xf32> to vector<2x32xf32>
    %139 = vector.extract_strided_slice %135 {offsets = [0, 96], sizes = [2, 32], strides = [1, 1]} : vector<2x128xf32> to vector<2x32xf32>
    %140 = vector.extract_strided_slice %136 {offsets = [0, 64], sizes = [2, 32], strides = [1, 1]} : vector<2x128xf32> to vector<2x32xf32>
    %141 = arith.mulf %138, %105 : vector<2x32xf32>
    %142 = arith.mulf %137, %140 : vector<2x32xf32>
    %143 = arith.addf %141, %142 : vector<2x32xf32>
    %144 = math.tanh %143 : vector<2x32xf32>
    %145 = arith.mulf %139, %144 : vector<2x32xf32>
    %146 = arith.negf %130 : vector<2x128xf32>
    %147 = math.exp %146 : vector<2x128xf32>
    %cst_48 = arith.constant 1.000000e+00 : f32
    %148 = vector.broadcast %cst_48 : f32 to vector<2x128xf32>
    %149 = arith.addf %148, %147 : vector<2x128xf32>
    %150 = arith.divf %148, %149 : vector<2x128xf32>
    %151 = math.tanh %130 : vector<2x128xf32>
    %152 = vector.extract_strided_slice %150 {offsets = [0, 0], sizes = [2, 32], strides = [1, 1]} : vector<2x128xf32> to vector<2x32xf32>
    %153 = vector.extract_strided_slice %150 {offsets = [0, 32], sizes = [2, 32], strides = [1, 1]} : vector<2x128xf32> to vector<2x32xf32>
    %154 = vector.extract_strided_slice %150 {offsets = [0, 96], sizes = [2, 32], strides = [1, 1]} : vector<2x128xf32> to vector<2x32xf32>
    %155 = vector.extract_strided_slice %151 {offsets = [0, 64], sizes = [2, 32], strides = [1, 1]} : vector<2x128xf32> to vector<2x32xf32>
    %156 = arith.mulf %153, %120 : vector<2x32xf32>
    %157 = arith.mulf %152, %155 : vector<2x32xf32>
    %158 = arith.addf %156, %157 : vector<2x32xf32>
    %159 = math.tanh %158 : vector<2x32xf32>
    %160 = arith.mulf %154, %159 : vector<2x32xf32>
    %c6_49 = arith.constant 6 : index
    %c0_50 = arith.constant 0 : index
    %161 = vector.load %arg12[%c6_49, %c0_50] : memref<16x32xf32, #tpu.memory_space<vmem>>, vector<2x32xf32>
    tpu.vector_store %arg12[%c6_49, %c0_50], %145 {strides = array<i32>} : memref<16x32xf32, #tpu.memory_space<vmem>>, vector<2x32xf32>,
    %c8_51 = arith.constant 8 : index
    %c0_52 = arith.constant 0 : index
    %162 = vector.load %arg13[%c8_51, %c0_52] : memref<16x32xf32, #tpu.memory_space<vmem>>, vector<2x32xf32>
    tpu.vector_store %arg13[%c8_51, %c0_52], %160 {strides = array<i32>} : memref<16x32xf32, #tpu.memory_space<vmem>>, vector<2x32xf32>,
    %c8_53 = arith.constant 8 : index
    %c0_54 = arith.constant 0 : index
    %163 = vector.load %arg11[%c8_53, %c0_54] : memref<16x288xf32, #tpu.memory_space<vmem>>, vector<2x128xf32>
    %cst_55 = arith.constant dense<0.000000e+00> : vector<2x128xf32>
    %164 = tpu.matmul %145, %8, %cst_55 {dimension_numbers = #tpu.dot_dimension_numbers<[1], [0], [0], [1], [0, 0, 1, 1], [], []>} : vector<2x32xf32>, vector<32x128xf32>, vector<2x128xf32> -> vector<2x128xf32>
    %165 = arith.addf %163, %164 : vector<2x128xf32>
    %c6_56 = arith.constant 6 : index
    %c128_57 = arith.constant 128 : index
    %166 = vector.load %arg11[%c6_56, %c128_57] : memref<16x288xf32, #tpu.memory_space<vmem>>, vector<2x128xf32>
    %cst_58 = arith.constant dense<0.000000e+00> : vector<2x128xf32>
    %167 = tpu.matmul %160, %9, %cst_58 {dimension_numbers = #tpu.dot_dimension_numbers<[1], [0], [0], [1], [0, 0, 1, 1], [], []>} : vector<2x32xf32>, vector<32x128xf32>, vector<2x128xf32> -> vector<2x128xf32>
    %168 = arith.addf %166, %167 : vector<2x128xf32>
    %169 = arith.negf %165 : vector<2x128xf32>
    %170 = math.exp %169 : vector<2x128xf32>
    %cst_59 = arith.constant 1.000000e+00 : f32
    %171 = vector.broadcast %cst_59 : f32 to vector<2x128xf32>
    %172 = arith.addf %171, %170 : vector<2x128xf32>
    %173 = arith.divf %171, %172 : vector<2x128xf32>
    %174 = math.tanh %165 : vector<2x128xf32>
    %175 = vector.extract_strided_slice %173 {offsets = [0, 0], sizes = [2, 32], strides = [1, 1]} : vector<2x128xf32> to vector<2x32xf32>
    %176 = vector.extract_strided_slice %173 {offsets = [0, 32], sizes = [2, 32], strides = [1, 1]} : vector<2x128xf32> to vector<2x32xf32>
    %177 = vector.extract_strided_slice %173 {offsets = [0, 96], sizes = [2, 32], strides = [1, 1]} : vector<2x128xf32> to vector<2x32xf32>
    %178 = vector.extract_strided_slice %174 {offsets = [0, 64], sizes = [2, 32], strides = [1, 1]} : vector<2x128xf32> to vector<2x32xf32>
    %179 = arith.mulf %176, %143 : vector<2x32xf32>
    %180 = arith.mulf %175, %178 : vector<2x32xf32>
    %181 = arith.addf %179, %180 : vector<2x32xf32>
    %182 = math.tanh %181 : vector<2x32xf32>
    %183 = arith.mulf %177, %182 : vector<2x32xf32>
    %184 = arith.negf %168 : vector<2x128xf32>
    %185 = math.exp %184 : vector<2x128xf32>
    %cst_60 = arith.constant 1.000000e+00 : f32
    %186 = vector.broadcast %cst_60 : f32 to vector<2x128xf32>
    %187 = arith.addf %186, %185 : vector<2x128xf32>
    %188 = arith.divf %186, %187 : vector<2x128xf32>
    %189 = math.tanh %168 : vector<2x128xf32>
    %190 = vector.extract_strided_slice %188 {offsets = [0, 0], sizes = [2, 32], strides = [1, 1]} : vector<2x128xf32> to vector<2x32xf32>
    %191 = vector.extract_strided_slice %188 {offsets = [0, 32], sizes = [2, 32], strides = [1, 1]} : vector<2x128xf32> to vector<2x32xf32>
    %192 = vector.extract_strided_slice %188 {offsets = [0, 96], sizes = [2, 32], strides = [1, 1]} : vector<2x128xf32> to vector<2x32xf32>
    %193 = vector.extract_strided_slice %189 {offsets = [0, 64], sizes = [2, 32], strides = [1, 1]} : vector<2x128xf32> to vector<2x32xf32>
    %194 = arith.mulf %191, %158 : vector<2x32xf32>
    %195 = arith.mulf %190, %193 : vector<2x32xf32>
    %196 = arith.addf %194, %195 : vector<2x32xf32>
    %197 = math.tanh %196 : vector<2x32xf32>
    %198 = arith.mulf %192, %197 : vector<2x32xf32>
    %c8_61 = arith.constant 8 : index
    %c0_62 = arith.constant 0 : index
    %199 = vector.load %arg12[%c8_61, %c0_62] : memref<16x32xf32, #tpu.memory_space<vmem>>, vector<2x32xf32>
    tpu.vector_store %arg12[%c8_61, %c0_62], %183 {strides = array<i32>} : memref<16x32xf32, #tpu.memory_space<vmem>>, vector<2x32xf32>,
    %c6_63 = arith.constant 6 : index
    %c0_64 = arith.constant 0 : index
    %200 = vector.load %arg13[%c6_63, %c0_64] : memref<16x32xf32, #tpu.memory_space<vmem>>, vector<2x32xf32>
    tpu.vector_store %arg13[%c6_63, %c0_64], %198 {strides = array<i32>} : memref<16x32xf32, #tpu.memory_space<vmem>>, vector<2x32xf32>,
    %c10_65 = arith.constant 10 : index
    %c0_66 = arith.constant 0 : index
    %201 = vector.load %arg11[%c10_65, %c0_66] : memref<16x288xf32, #tpu.memory_space<vmem>>, vector<2x128xf32>
    %cst_67 = arith.constant dense<0.000000e+00> : vector<2x128xf32>
    %202 = tpu.matmul %183, %8, %cst_67 {dimension_numbers = #tpu.dot_dimension_numbers<[1], [0], [0], [1], [0, 0, 1, 1], [], []>} : vector<2x32xf32>, vector<32x128xf32>, vector<2x128xf32> -> vector<2x128xf32>
    %203 = arith.addf %201, %202 : vector<2x128xf32>
    %c4_68 = arith.constant 4 : index
    %c128_69 = arith.constant 128 : index
    %204 = vector.load %arg11[%c4_68, %c128_69] : memref<16x288xf32, #tpu.memory_space<vmem>>, vector<2x128xf32>
    %cst_70 = arith.constant dense<0.000000e+00> : vector<2x128xf32>
    %205 = tpu.matmul %198, %9, %cst_70 {dimension_numbers = #tpu.dot_dimension_numbers<[1], [0], [0], [1], [0, 0, 1, 1], [], []>} : vector<2x32xf32>, vector<32x128xf32>, vector<2x128xf32> -> vector<2x128xf32>
    %206 = arith.addf %204, %205 : vector<2x128xf32>
    %207 = arith.negf %203 : vector<2x128xf32>
    %208 = math.exp %207 : vector<2x128xf32>
    %cst_71 = arith.constant 1.000000e+00 : f32
    %209 = vector.broadcast %cst_71 : f32 to vector<2x128xf32>
    %210 = arith.addf %209, %208 : vector<2x128xf32>
    %211 = arith.divf %209, %210 : vector<2x128xf32>
    %212 = math.tanh %203 : vector<2x128xf32>
    %213 = vector.extract_strided_slice %211 {offsets = [0, 0], sizes = [2, 32], strides = [1, 1]} : vector<2x128xf32> to vector<2x32xf32>
    %214 = vector.extract_strided_slice %211 {offsets = [0, 32], sizes = [2, 32], strides = [1, 1]} : vector<2x128xf32> to vector<2x32xf32>
    %215 = vector.extract_strided_slice %211 {offsets = [0, 96], sizes = [2, 32], strides = [1, 1]} : vector<2x128xf32> to vector<2x32xf32>
    %216 = vector.extract_strided_slice %212 {offsets = [0, 64], sizes = [2, 32], strides = [1, 1]} : vector<2x128xf32> to vector<2x32xf32>
    %217 = arith.mulf %214, %181 : vector<2x32xf32>
    %218 = arith.mulf %213, %216 : vector<2x32xf32>
    %219 = arith.addf %217, %218 : vector<2x32xf32>
    %220 = math.tanh %219 : vector<2x32xf32>
    %221 = arith.mulf %215, %220 : vector<2x32xf32>
    %222 = arith.negf %206 : vector<2x128xf32>
    %223 = math.exp %222 : vector<2x128xf32>
    %cst_72 = arith.constant 1.000000e+00 : f32
    %224 = vector.broadcast %cst_72 : f32 to vector<2x128xf32>
    %225 = arith.addf %224, %223 : vector<2x128xf32>
    %226 = arith.divf %224, %225 : vector<2x128xf32>
    %227 = math.tanh %206 : vector<2x128xf32>
    %228 = vector.extract_strided_slice %226 {offsets = [0, 0], sizes = [2, 32], strides = [1, 1]} : vector<2x128xf32> to vector<2x32xf32>
    %229 = vector.extract_strided_slice %226 {offsets = [0, 32], sizes = [2, 32], strides = [1, 1]} : vector<2x128xf32> to vector<2x32xf32>
    %230 = vector.extract_strided_slice %226 {offsets = [0, 96], sizes = [2, 32], strides = [1, 1]} : vector<2x128xf32> to vector<2x32xf32>
    %231 = vector.extract_strided_slice %227 {offsets = [0, 64], sizes = [2, 32], strides = [1, 1]} : vector<2x128xf32> to vector<2x32xf32>
    %232 = arith.mulf %229, %196 : vector<2x32xf32>
    %233 = arith.mulf %228, %231 : vector<2x32xf32>
    %234 = arith.addf %232, %233 : vector<2x32xf32>
    %235 = math.tanh %234 : vector<2x32xf32>
    %236 = arith.mulf %230, %235 : vector<2x32xf32>
    %c10_73 = arith.constant 10 : index
    %c0_74 = arith.constant 0 : index
    %237 = vector.load %arg12[%c10_73, %c0_74] : memref<16x32xf32, #tpu.memory_space<vmem>>, vector<2x32xf32>
    tpu.vector_store %arg12[%c10_73, %c0_74], %221 {strides = array<i32>} : memref<16x32xf32, #tpu.memory_space<vmem>>, vector<2x32xf32>,
    %c4_75 = arith.constant 4 : index
    %c0_76 = arith.constant 0 : index
    %238 = vector.load %arg13[%c4_75, %c0_76] : memref<16x32xf32, #tpu.memory_space<vmem>>, vector<2x32xf32>
    tpu.vector_store %arg13[%c4_75, %c0_76], %236 {strides = array<i32>} : memref<16x32xf32, #tpu.memory_space<vmem>>, vector<2x32xf32>,
    %c12_77 = arith.constant 12 : index
    %c0_78 = arith.constant 0 : index
    %239 = vector.load %arg11[%c12_77, %c0_78] : memref<16x288xf32, #tpu.memory_space<vmem>>, vector<2x128xf32>
    %cst_79 = arith.constant dense<0.000000e+00> : vector<2x128xf32>
    %240 = tpu.matmul %221, %8, %cst_79 {dimension_numbers = #tpu.dot_dimension_numbers<[1], [0], [0], [1], [0, 0, 1, 1], [], []>} : vector<2x32xf32>, vector<32x128xf32>, vector<2x128xf32> -> vector<2x128xf32>
    %241 = arith.addf %239, %240 : vector<2x128xf32>
    %c2_80 = arith.constant 2 : index
    %c128_81 = arith.constant 128 : index
    %242 = vector.load %arg11[%c2_80, %c128_81] : memref<16x288xf32, #tpu.memory_space<vmem>>, vector<2x128xf32>
    %cst_82 = arith.constant dense<0.000000e+00> : vector<2x128xf32>
    %243 = tpu.matmul %236, %9, %cst_82 {dimension_numbers = #tpu.dot_dimension_numbers<[1], [0], [0], [1], [0, 0, 1, 1], [], []>} : vector<2x32xf32>, vector<32x128xf32>, vector<2x128xf32> -> vector<2x128xf32>
    %244 = arith.addf %242, %243 : vector<2x128xf32>
    %245 = arith.negf %241 : vector<2x128xf32>
    %246 = math.exp %245 : vector<2x128xf32>
    %cst_83 = arith.constant 1.000000e+00 : f32
    %247 = vector.broadcast %cst_83 : f32 to vector<2x128xf32>
    %248 = arith.addf %247, %246 : vector<2x128xf32>
    %249 = arith.divf %247, %248 : vector<2x128xf32>
    %250 = math.tanh %241 : vector<2x128xf32>
    %251 = vector.extract_strided_slice %249 {offsets = [0, 0], sizes = [2, 32], strides = [1, 1]} : vector<2x128xf32> to vector<2x32xf32>
    %252 = vector.extract_strided_slice %249 {offsets = [0, 32], sizes = [2, 32], strides = [1, 1]} : vector<2x128xf32> to vector<2x32xf32>
    %253 = vector.extract_strided_slice %249 {offsets = [0, 96], sizes = [2, 32], strides = [1, 1]} : vector<2x128xf32> to vector<2x32xf32>
    %254 = vector.extract_strided_slice %250 {offsets = [0, 64], sizes = [2, 32], strides = [1, 1]} : vector<2x128xf32> to vector<2x32xf32>
    %255 = arith.mulf %252, %219 : vector<2x32xf32>
    %256 = arith.mulf %251, %254 : vector<2x32xf32>
    %257 = arith.addf %255, %256 : vector<2x32xf32>
    %258 = math.tanh %257 : vector<2x32xf32>
    %259 = arith.mulf %253, %258 : vector<2x32xf32>
    %260 = arith.negf %244 : vector<2x128xf32>
    %261 = math.exp %260 : vector<2x128xf32>
    %cst_84 = arith.constant 1.000000e+00 : f32
    %262 = vector.broadcast %cst_84 : f32 to vector<2x128xf32>
    %263 = arith.addf %262, %261 : vector<2x128xf32>
    %264 = arith.divf %262, %263 : vector<2x128xf32>
    %265 = math.tanh %244 : vector<2x128xf32>
    %266 = vector.extract_strided_slice %264 {offsets = [0, 0], sizes = [2, 32], strides = [1, 1]} : vector<2x128xf32> to vector<2x32xf32>
    %267 = vector.extract_strided_slice %264 {offsets = [0, 32], sizes = [2, 32], strides = [1, 1]} : vector<2x128xf32> to vector<2x32xf32>
    %268 = vector.extract_strided_slice %264 {offsets = [0, 96], sizes = [2, 32], strides = [1, 1]} : vector<2x128xf32> to vector<2x32xf32>
    %269 = vector.extract_strided_slice %265 {offsets = [0, 64], sizes = [2, 32], strides = [1, 1]} : vector<2x128xf32> to vector<2x32xf32>
    %270 = arith.mulf %267, %234 : vector<2x32xf32>
    %271 = arith.mulf %266, %269 : vector<2x32xf32>
    %272 = arith.addf %270, %271 : vector<2x32xf32>
    %273 = math.tanh %272 : vector<2x32xf32>
    %274 = arith.mulf %268, %273 : vector<2x32xf32>
    %c12_85 = arith.constant 12 : index
    %c0_86 = arith.constant 0 : index
    %275 = vector.load %arg12[%c12_85, %c0_86] : memref<16x32xf32, #tpu.memory_space<vmem>>, vector<2x32xf32>
    tpu.vector_store %arg12[%c12_85, %c0_86], %259 {strides = array<i32>} : memref<16x32xf32, #tpu.memory_space<vmem>>, vector<2x32xf32>,
    %c2_87 = arith.constant 2 : index
    %c0_88 = arith.constant 0 : index
    %276 = vector.load %arg13[%c2_87, %c0_88] : memref<16x32xf32, #tpu.memory_space<vmem>>, vector<2x32xf32>
    tpu.vector_store %arg13[%c2_87, %c0_88], %274 {strides = array<i32>} : memref<16x32xf32, #tpu.memory_space<vmem>>, vector<2x32xf32>,
    %c14_89 = arith.constant 14 : index
    %c0_90 = arith.constant 0 : index
    %277 = vector.load %arg11[%c14_89, %c0_90] : memref<16x288xf32, #tpu.memory_space<vmem>>, vector<2x128xf32>
    %cst_91 = arith.constant dense<0.000000e+00> : vector<2x128xf32>
    %278 = tpu.matmul %259, %8, %cst_91 {dimension_numbers = #tpu.dot_dimension_numbers<[1], [0], [0], [1], [0, 0, 1, 1], [], []>} : vector<2x32xf32>, vector<32x128xf32>, vector<2x128xf32> -> vector<2x128xf32>
    %279 = arith.addf %277, %278 : vector<2x128xf32>
    %c0_92 = arith.constant 0 : index
    %c128_93 = arith.constant 128 : index
    %280 = vector.load %arg11[%c0_92, %c128_93] : memref<16x288xf32, #tpu.memory_space<vmem>>, vector<2x128xf32>
    %cst_94 = arith.constant dense<0.000000e+00> : vector<2x128xf32>
    %281 = tpu.matmul %274, %9, %cst_94 {dimension_numbers = #tpu.dot_dimension_numbers<[1], [0], [0], [1], [0, 0, 1, 1], [], []>} : vector<2x32xf32>, vector<32x128xf32>, vector<2x128xf32> -> vector<2x128xf32>
    %282 = arith.addf %280, %281 : vector<2x128xf32>
    %283 = arith.negf %279 : vector<2x128xf32>
    %284 = math.exp %283 : vector<2x128xf32>
    %cst_95 = arith.constant 1.000000e+00 : f32
    %285 = vector.broadcast %cst_95 : f32 to vector<2x128xf32>
    %286 = arith.addf %285, %284 : vector<2x128xf32>
    %287 = arith.divf %285, %286 : vector<2x128xf32>
    %288 = math.tanh %279 : vector<2x128xf32>
    %289 = vector.extract_strided_slice %287 {offsets = [0, 0], sizes = [2, 32], strides = [1, 1]} : vector<2x128xf32> to vector<2x32xf32>
    %290 = vector.extract_strided_slice %287 {offsets = [0, 32], sizes = [2, 32], strides = [1, 1]} : vector<2x128xf32> to vector<2x32xf32>
    %291 = vector.extract_strided_slice %287 {offsets = [0, 96], sizes = [2, 32], strides = [1, 1]} : vector<2x128xf32> to vector<2x32xf32>
    %292 = vector.extract_strided_slice %288 {offsets = [0, 64], sizes = [2, 32], strides = [1, 1]} : vector<2x128xf32> to vector<2x32xf32>
    %293 = arith.mulf %290, %257 : vector<2x32xf32>
    %294 = arith.mulf %289, %292 : vector<2x32xf32>
    %295 = arith.addf %293, %294 : vector<2x32xf32>
    %296 = math.tanh %295 : vector<2x32xf32>
    %297 = arith.mulf %291, %296 : vector<2x32xf32>
    %298 = arith.negf %282 : vector<2x128xf32>
    %299 = math.exp %298 : vector<2x128xf32>
    %cst_96 = arith.constant 1.000000e+00 : f32
    %300 = vector.broadcast %cst_96 : f32 to vector<2x128xf32>
    %301 = arith.addf %300, %299 : vector<2x128xf32>
    %302 = arith.divf %300, %301 : vector<2x128xf32>
    %303 = math.tanh %282 : vector<2x128xf32>
    %304 = vector.extract_strided_slice %302 {offsets = [0, 0], sizes = [2, 32], strides = [1, 1]} : vector<2x128xf32> to vector<2x32xf32>
    %305 = vector.extract_strided_slice %302 {offsets = [0, 32], sizes = [2, 32], strides = [1, 1]} : vector<2x128xf32> to vector<2x32xf32>
    %306 = vector.extract_strided_slice %302 {offsets = [0, 96], sizes = [2, 32], strides = [1, 1]} : vector<2x128xf32> to vector<2x32xf32>
    %307 = vector.extract_strided_slice %303 {offsets = [0, 64], sizes = [2, 32], strides = [1, 1]} : vector<2x128xf32> to vector<2x32xf32>
    %308 = arith.mulf %305, %272 : vector<2x32xf32>
    %309 = arith.mulf %304, %307 : vector<2x32xf32>
    %310 = arith.addf %308, %309 : vector<2x32xf32>
    %311 = math.tanh %310 : vector<2x32xf32>
    %312 = arith.mulf %306, %311 : vector<2x32xf32>
    %c14_97 = arith.constant 14 : index
    %c0_98 = arith.constant 0 : index
    %313 = vector.load %arg12[%c14_97, %c0_98] : memref<16x32xf32, #tpu.memory_space<vmem>>, vector<2x32xf32>
    tpu.vector_store %arg12[%c14_97, %c0_98], %297 {strides = array<i32>} : memref<16x32xf32, #tpu.memory_space<vmem>>, vector<2x32xf32>,
    %c0_99 = arith.constant 0 : index
    %c0_100 = arith.constant 0 : index
    %314 = vector.load %arg13[%c0_99, %c0_100] : memref<16x32xf32, #tpu.memory_space<vmem>>, vector<2x32xf32>
    tpu.vector_store %arg13[%c0_99, %c0_100], %312 {strides = array<i32>} : memref<16x32xf32, #tpu.memory_space<vmem>>, vector<2x32xf32>,
    %c0_101 = arith.constant 0 : index
    %c256 = arith.constant 256 : index
    %315 = vector.load %arg11[%c0_101, %c256] : memref<16x288xf32, #tpu.memory_space<vmem>>, vector<16x32xf32>
    %c0_102 = arith.constant 0 : index
    %c0_103 = arith.constant 0 : index
    %316 = vector.load %arg12[%c0_102, %c0_103] : memref<16x32xf32, #tpu.memory_space<vmem>>, vector<16x32xf32>
    %c0_104 = arith.constant 0 : index
    %c0_105 = arith.constant 0 : index
    %317 = vector.load %arg6[%c0_104, %c0_105] : memref<32x32xf32, #tpu.memory_space<vmem>>, vector<32x32xf32>
    %cst_106 = arith.constant dense<0.000000e+00> : vector<16x32xf32>
    %318 = tpu.matmul %316, %317, %cst_106 {dimension_numbers = #tpu.dot_dimension_numbers<[1], [0], [0], [1], [0, 0, 1, 1], [], []>} : vector<16x32xf32>, vector<32x32xf32>, vector<16x32xf32> -> vector<16x32xf32>
    %319 = arith.addf %315, %318 : vector<16x32xf32>
    %c0_107 = arith.constant 0 : index
    %c0_108 = arith.constant 0 : index
    %320 = vector.load %arg13[%c0_107, %c0_108] : memref<16x32xf32, #tpu.memory_space<vmem>>, vector<16x32xf32>
    %c0_109 = arith.constant 0 : index
    %c0_110 = arith.constant 0 : index
    %321 = vector.load %arg7[%c0_109, %c0_110] : memref<32x32xf32, #tpu.memory_space<vmem>>, vector<32x32xf32>
    %cst_111 = arith.constant dense<0.000000e+00> : vector<16x32xf32>
    %322 = tpu.matmul %320, %321, %cst_111 {dimension_numbers = #tpu.dot_dimension_numbers<[1], [0], [0], [1], [0, 0, 1, 1], [], []>} : vector<16x32xf32>, vector<32x32xf32>, vector<16x32xf32> -> vector<16x32xf32>
    %323 = arith.addf %319, %322 : vector<16x32xf32>
    %324 = math.tanh %323 : vector<16x32xf32>
    %325 = vector.extract_strided_slice %324 {offsets = [0, 0], sizes = [2, 32], strides = [1, 1]} : vector<16x32xf32> to vector<2x32xf32>
    %326 = vector.extract_strided_slice %324 {offsets = [2, 0], sizes = [2, 32], strides = [1, 1]} : vector<16x32xf32> to vector<2x32xf32>
    %327 = arith.maximumf %325, %326 : vector<2x32xf32>
    %328 = vector.extract_strided_slice %324 {offsets = [4, 0], sizes = [2, 32], strides = [1, 1]} : vector<16x32xf32> to vector<2x32xf32>
    %329 = arith.maximumf %327, %328 : vector<2x32xf32>
    %330 = vector.extract_strided_slice %324 {offsets = [6, 0], sizes = [2, 32], strides = [1, 1]} : vector<16x32xf32> to vector<2x32xf32>
    %331 = arith.maximumf %329, %330 : vector<2x32xf32>
    %332 = vector.extract_strided_slice %324 {offsets = [8, 0], sizes = [2, 32], strides = [1, 1]} : vector<16x32xf32> to vector<2x32xf32>
    %333 = arith.maximumf %331, %332 : vector<2x32xf32>
    %334 = vector.extract_strided_slice %324 {offsets = [10, 0], sizes = [2, 32], strides = [1, 1]} : vector<16x32xf32> to vector<2x32xf32>
    %335 = arith.maximumf %333, %334 : vector<2x32xf32>
    %336 = vector.extract_strided_slice %324 {offsets = [12, 0], sizes = [2, 32], strides = [1, 1]} : vector<16x32xf32> to vector<2x32xf32>
    %337 = arith.maximumf %335, %336 : vector<2x32xf32>
    %338 = vector.extract_strided_slice %324 {offsets = [14, 0], sizes = [2, 32], strides = [1, 1]} : vector<16x32xf32> to vector<2x32xf32>
    %339 = arith.maximumf %337, %338 : vector<2x32xf32>
    %c0_112 = arith.constant 0 : index
    %c0_113 = arith.constant 0 : index
    %340 = vector.load %arg8[%c0_112, %c0_113] : memref<32x128xf32, #tpu.memory_space<vmem>>, vector<32x128xf32>
    %cst_114 = arith.constant dense<0.000000e+00> : vector<2x128xf32>
    %341 = tpu.matmul %339, %340, %cst_114 {dimension_numbers = #tpu.dot_dimension_numbers<[1], [0], [0], [1], [0, 0, 1, 1], [], []>} : vector<2x32xf32>, vector<32x128xf32>, vector<2x128xf32> -> vector<2x128xf32>
    %c0_115 = arith.constant 0 : index
    %c0_116 = arith.constant 0 : index
    %342 = vector.load %arg9[%c0_115, %c0_116] : memref<1x128xf32, #tpu.memory_space<vmem>>, vector<1x128xf32>
    %343 = vector.broadcast %342 : vector<1x128xf32> to vector<2x128xf32>
    %344 = arith.addf %341, %343 : vector<2x128xf32>
    %c0_117 = arith.constant 0 : index
    %c0_118 = arith.constant 0 : index
    %345 = vector.load %arg10[%c0_117, %c0_118] : memref<2x128xf32, #tpu.memory_space<vmem>>, vector<2x128xf32>
    tpu.vector_store %arg10[%c0_117, %c0_118], %344 {strides = array<i32>} : memref<2x128xf32, #tpu.memory_space<vmem>>, vector<2x128xf32>,
    return
  }
  func.func @transform_0(%arg0: i32) -> (i32, i32, i32) {
    %c0_i32 = arith.constant 0 : i32
    %c0_i32_0 = arith.constant 0 : i32
    %c0_i32_1 = arith.constant 0 : i32
    return %arg0, %c0_i32, %c0_i32_0 : i32, i32, i32
  }
  func.func @transform_1(%arg0: i32) -> (i32, i32) {
    %c0_i32 = arith.constant 0 : i32
    %c0_i32_0 = arith.constant 0 : i32
    %c0_i32_1 = arith.constant 0 : i32
    return %c0_i32, %c0_i32_0 : i32, i32
  }
  func.func @transform_2(%arg0: i32) -> (i32, i32) {
    %c0_i32 = arith.constant 0 : i32
    %c0_i32_0 = arith.constant 0 : i32
    %c0_i32_1 = arith.constant 0 : i32
    return %c0_i32, %c0_i32_0 : i32, i32
  }
  func.func @transform_3(%arg0: i32) -> (i32, i32) {
    %c0_i32 = arith.constant 0 : i32
    %c0_i32_0 = arith.constant 0 : i32
    %c0_i32_1 = arith.constant 0 : i32
    return %c0_i32, %c0_i32_0 : i32, i32
  }
  func.func @transform_4(%arg0: i32) -> (i32, i32) {
    %c0_i32 = arith.constant 0 : i32
    %c0_i32_0 = arith.constant 0 : i32
    %c0_i32_1 = arith.constant 0 : i32
    return %c0_i32, %c0_i32_0 : i32, i32
  }
  func.func @transform_5(%arg0: i32) -> (i32, i32) {
    %c0_i32 = arith.constant 0 : i32
    %c0_i32_0 = arith.constant 0 : i32
    %c0_i32_1 = arith.constant 0 : i32
    return %c0_i32, %c0_i32_0 : i32, i32
  }
  func.func @transform_6(%arg0: i32) -> (i32, i32) {
    %c0_i32 = arith.constant 0 : i32
    %c0_i32_0 = arith.constant 0 : i32
    %c0_i32_1 = arith.constant 0 : i32
    return %c0_i32, %c0_i32_0 : i32, i32
  }
  func.func @transform_7(%arg0: i32) -> (i32, i32) {
    %c0_i32 = arith.constant 0 : i32
    %c0_i32_0 = arith.constant 0 : i32
    %c0_i32_1 = arith.constant 0 : i32
    return %c0_i32, %c0_i32_0 : i32, i32
  }
  func.func @transform_8(%arg0: i32) -> (i32, i32) {
    %c0_i32 = arith.constant 0 : i32
    %c0_i32_0 = arith.constant 0 : i32
    %c0_i32_1 = arith.constant 0 : i32
    return %c0_i32, %c0_i32_0 : i32, i32
  }
  func.func @transform_9(%arg0: i32) -> (i32, i32) {
    %c0_i32 = arith.constant 0 : i32
    %c0_i32_0 = arith.constant 0 : i32
    return %arg0, %c0_i32 : i32, i32
  }
}

</mosaic_0001>

<bundles_post_ra>
// kernel: tpu_custom_call.1
= control target key start
LH: loop header
LB: loop body
LE: loop exit
PB: predicated region body
PF: predicated region fallthrough
CT: control target
= control target key end

     0   :  { %14 = vsyncpa [#allocation6], 0  ;;  %s3735_s0 = inlined_call_operand.hbm [shape: f32[1,16,32], index: 0, kind: input, shape index: {}]   ;;  %s3736_s1 = inlined_call_operand.hbm [shape: f32[32,288], index: 1, kind: input, shape index: {}]   ;;  %s3737_s2 = inlined_call_operand.vmem [shape: f32[1,288], index: 2, kind: input, shape index: {}]   ;;  %s3738_s3 = inlined_call_operand.hbm [shape: f32[32,128], index: 3, kind: input, shape index: {}]   ;;  %s3739_s4 = inlined_call_operand.hbm [shape: f32[32,128], index: 4, kind: input, shape index: {}]   ;;  %s3740_s5 = inlined_call_operand.hbm [shape: f32[32,32], index: 5, kind: input, shape index: {}]   ;;  %s3741_s6 = inlined_call_operand.hbm [shape: f32[32,32], index: 6, kind: input, shape index: {}]   ;;  %s3742_s7 = inlined_call_operand.hbm [shape: f32[32,128], index: 7, kind: input, shape index: {}]   ;;  %s3743_s8 = inlined_call_operand.vmem [shape: f32[1,128], index: 8, kind: input, shape index: {}]   ;;  %s3744_s9 = inlined_call_operand.hbm [shape: f32[2,128], index: 9, kind: output, shape index: {}]  }
   0x1   :  { %15 = vsyncpa [#allocation9], 0 }
   0x2   :  { %16 = vsyncpa [#allocation12], 0 }
   0x3   :  { %17 = vsyncpa [#allocation15], 0 }
   0x4   :  { %18 = vsyncpa [#allocation7], 0  ;;  %s3236_s30 = smov [#allocation8]   ;;  %s3050_s13 = scalar_lea.hbm %s3736_s1, 1536 }
   0x5   :  { %s36_s10 = sshll.u32 %s3236_s30, 4  ;;  %p3051_p0 = scmp.ne.s32.totalorder %s3736_s1, %s3050_s13  ;;  %s37_s10 = int_to_ptr.vmem [resolvable:$true] %s36_s10 }
   0x6   :  { %p3054_p1 = scmp.lt.u32.totalorder %s3050_s13, %s3736_s1 }
   0x8   :  { %p3056_p2 = pnand %p3054_p1, %p3051_p0 }
   0xa   :  { %3059 = shalt.err (!%p3056_p2)
}
   0xb   :  { %s3060_s18 = scalar_lea.vmem %s37_s10, 1536  ;;  %p3065_p4 = scmp.lt.s32.totalorder %s37_s10, %s37_s10 }
   0xc   :  { %p3061_p3 = scmp.ne.s32.totalorder %s37_s10, %s3060_s18  ;;  %p3066_p5 = scmp.lt.s32.totalorder %s3060_s18, %s3060_s18 }
   0xe   :  { %p3067_p6 = por %p3066_p5, %p3065_p4 }
  0x10   :  { %p3068_p7 = pnand %p3067_p6, %p3061_p3 }
  0x12   :  { %3071 = shalt.err (!%p3068_p7)
}
  0x13   :  { %s3237_s19 = smov 384   ;;  %s3238_s20 = smov 24  }
  0x14   :  { %42 = dma.hbm_to_vmem [thread:$0]  %s3736_s1, 1536, %s37_s10, [#allocation9], %s3237_s19, %s3237_s19, %s3238_s20  }
  0x15   :  { %s3239_s23 = smov [#allocation11]   ;;  %s3240_s25 = smov [#allocation14]  }
  0x16   :  { %s62_s24 = sshll.u32 %s3239_s23, 4  ;;  %s86_s26 = sshll.u32 %s3240_s25, 4  ;;  %s63_s24 = int_to_ptr.vmem [resolvable:$true] %s62_s24  ;;  %s87_s26 = int_to_ptr.vmem [resolvable:$true] %s86_s26 }
  0x17   :  { %s3072_s29 = scalar_lea.hbm %s3739_s4, 512 }
  0x18   :  { %p3073_p8 = scmp.ne.s32.totalorder %s3739_s4, %s3072_s29  ;;  %p3076_p9 = scmp.lt.u32.totalorder %s3072_s29, %s3739_s4 }
  0x1a   :  { %p3078_p10 = pnand %p3076_p9, %p3073_p8 }
  0x1c   :  { %3081 = shalt.err (!%p3078_p10)
}
  0x1d   :  { %s3082_s1 = scalar_lea.vmem %s63_s24, 512  ;;  %p3087_p12 = scmp.lt.s32.totalorder %s63_s24, %s63_s24 }
  0x1e   :  { %p3083_p11 = scmp.ne.s32.totalorder %s63_s24, %s3082_s1  ;;  %p3088_p13 = scmp.lt.s32.totalorder %s3082_s1, %s3082_s1 }
  0x20   :  { %p3089_p0 = por %p3088_p13, %p3087_p12 }
  0x22   :  { %p3090_p1 = pnand %p3089_p0, %p3083_p11 }
  0x24   :  { %3093 = shalt.err (!%p3090_p1)
}
  0x25   :  { %s3241_s10 = smov 128   ;;  %s3242_s14 = smov 8  }
  0x26   :  { %68 = dma.hbm_to_vmem [thread:$0]  %s3739_s4, 512, %s63_s24, [#allocation12], %s3241_s10, %s3241_s10, %s3242_s14  }
  0x27   :  { %s3094_s19 = scalar_lea.hbm %s3741_s6, 512 }
  0x28   :  { %p3095_p2 = scmp.ne.s32.totalorder %s3741_s6, %s3094_s19  ;;  %p3098_p3 = scmp.lt.u32.totalorder %s3094_s19, %s3741_s6 }
  0x2a   :  { %p3100_p4 = pnand %p3098_p3, %p3095_p2 }
  0x2c   :  { %3103 = shalt.err (!%p3100_p4)
}
  0x2d   :  { %s3104_s25 = scalar_lea.vmem %s87_s26, 512  ;;  %p3109_p6 = scmp.lt.s32.totalorder %s87_s26, %s87_s26 }
  0x2e   :  { %p3105_p5 = scmp.ne.s32.totalorder %s87_s26, %s3104_s25  ;;  %p3110_p7 = scmp.lt.s32.totalorder %s3104_s25, %s3104_s25 }
  0x30   :  { %p3111_p8 = por %p3110_p7, %p3109_p6 }
  0x32   :  { %p3112_p9 = pnand %p3111_p8, %p3105_p5 }
  0x34   :  { %3115 = shalt.err (!%p3112_p9)
}
  0x35   :  { %92 = dma.hbm_to_vmem [thread:$0]  %s3741_s6, 512, %s87_s26, [#allocation15], %s3241_s10, %s3241_s10, %s3242_s14  }
  0x36   :  { %s3243_s27 = smov [#allocation5]   ;;  %s3244_s29 = smov [#allocation10]  }
  0x37   :  { %s24_s28 = sshll.u32 %s3243_s27, 4  ;;  %s50_s30 = sshll.u32 %s3244_s29, 4  ;;  %s25_s28 = int_to_ptr.vmem [resolvable:$true] %s24_s28  ;;  %s51_s30 = int_to_ptr.vmem [resolvable:$true] %s50_s30 }
  0x38   :  { %s3116_s13 = scalar_lea.hbm %s3735_s0, 256 }
  0x39   :  { %p3117_p10 = scmp.ne.s32.totalorder %s3735_s0, %s3116_s13  ;;  %p3120_p11 = scmp.lt.u32.totalorder %s3116_s13, %s3735_s0 }
  0x3b   :  { %p3122_p12 = pnand %p3120_p11, %p3117_p10 }
  0x3d   :  { %3125 = shalt.err (!%p3122_p12)
}
  0x3e   :  { %s3126_s6 = scalar_lea.vmem %s25_s28, 256  ;;  %p3131_p0 = scmp.lt.s32.totalorder %s25_s28, %s25_s28 }
  0x3f   :  { %p3127_p13 = scmp.ne.s32.totalorder %s25_s28, %s3126_s6  ;;  %p3132_p1 = scmp.lt.s32.totalorder %s3126_s6, %s3126_s6 }
  0x41   :  { %p3133_p2 = por %p3132_p1, %p3131_p0 }
  0x43   :  { %p3134_p3 = pnand %p3133_p2, %p3127_p13 }
  0x45   :  { %3137 = shalt.err (!%p3134_p3)
}
  0x46   :  { %30 = dma.hbm_to_vmem [thread:$0]  %s3735_s0, 256, %s25_s28, [#allocation6], %s3241_s10, %s3241_s10, %s3242_s14  }
  0x47   :  { %s3138_s21 = scalar_lea.hbm %s3738_s3, 512 }
  0x48   :  { %p3139_p4 = scmp.ne.s32.totalorder %s3738_s3, %s3138_s21  ;;  %p3142_p5 = scmp.lt.u32.totalorder %s3138_s21, %s3738_s3 }
  0x4a   :  { %p3144_p6 = pnand %p3142_p5, %p3139_p4 }
  0x4c   :  { %3147 = shalt.err (!%p3144_p6)
}
  0x4d   :  { %s3148_s24 = scalar_lea.vmem %s51_s30, 512  ;;  %p3153_p8 = scmp.lt.s32.totalorder %s51_s30, %s51_s30 }
  0x4e   :  { %p3149_p7 = scmp.ne.s32.totalorder %s51_s30, %s3148_s24  ;;  %p3154_p9 = scmp.lt.s32.totalorder %s3148_s24, %s3148_s24 }
  0x50   :  { %p3155_p10 = por %p3154_p9, %p3153_p8 }
  0x52   :  { %p3156_p11 = pnand %p3155_p10, %p3149_p7 }
  0x54   :  { %3159 = shalt.err (!%p3156_p11)
}
  0x55   :  { %56 = dma.hbm_to_vmem [thread:$0]  %s3738_s3, 512, %s51_s30, [#allocation9], %s3241_s10, %s3241_s10, %s3242_s14  }
  0x56   :  { %s3245_s28 = smov [#allocation13]   ;;  %s3246_s11 = smov [#allocation16]  }
  0x57   :  { %s74_s29 = sshll.u32 %s3245_s28, 4  ;;  %s98_s12 = sshll.u32 %s3246_s11, 4  ;;  %s75_s29 = int_to_ptr.vmem [resolvable:$true] %s74_s29  ;;  %s99_s12 = int_to_ptr.vmem [resolvable:$true] %s98_s12 }
  0x58   :  { %s3160_s15 = scalar_lea.hbm %s3740_s5, 512 }
  0x59   :  { %p3161_p12 = scmp.ne.s32.totalorder %s3740_s5, %s3160_s15  ;;  %p3164_p13 = scmp.lt.u32.totalorder %s3160_s15, %s3740_s5 }
  0x5b   :  { %p3166_p0 = pnand %p3164_p13, %p3161_p12 }
  0x5d   :  { %3169 = shalt.err (!%p3166_p0)
}
  0x5e   :  { %s3170_s3 = scalar_lea.vmem %s75_s29, 512  ;;  %p3175_p2 = scmp.lt.s32.totalorder %s75_s29, %s75_s29 }
  0x5f   :  { %p3171_p1 = scmp.ne.s32.totalorder %s75_s29, %s3170_s3  ;;  %p3176_p3 = scmp.lt.s32.totalorder %s3170_s3, %s3170_s3 }
  0x61   :  { %p3177_p4 = por %p3176_p3, %p3175_p2 }
  0x63   :  { %p3178_p5 = pnand %p3177_p4, %p3171_p1 }
  0x65   :  { %3181 = shalt.err (!%p3178_p5)
}
  0x66   :  { %80 = dma.hbm_to_vmem [thread:$0]  %s3740_s5, 512, %s75_s29, [#allocation12], %s3241_s10, %s3241_s10, %s3242_s14  }
  0x67   :  { %s3182_s21 = scalar_lea.hbm %s3742_s7, 512 }
  0x68   :  { %p3183_p6 = scmp.ne.s32.totalorder %s3742_s7, %s3182_s21  ;;  %p3186_p7 = scmp.lt.u32.totalorder %s3182_s21, %s3742_s7 }
  0x6a   :  { %p3188_p8 = pnand %p3186_p7, %p3183_p6 }
  0x6c   :  { %3191 = shalt.err (!%p3188_p8)
}
  0x6d   :  { %s3192_s24 = scalar_lea.vmem %s99_s12, 512  ;;  %p3197_p10 = scmp.lt.s32.totalorder %s99_s12, %s99_s12 }
  0x6e   :  { %p3193_p9 = scmp.ne.s32.totalorder %s99_s12, %s3192_s24  ;;  %p3198_p11 = scmp.lt.s32.totalorder %s3192_s24, %s3192_s24 }
  0x70   :  { %p3199_p12 = por %p3198_p11, %p3197_p10 }
  0x72   :  { %p3200_p13 = pnand %p3199_p12, %p3193_p9 }
  0x74   :  { %3203 = shalt.err (!%p3200_p13)
}
  0x75   :  { %104 = dma.hbm_to_vmem [thread:$0]  %s3742_s7, 512, %s99_s12, [#allocation15], %s3241_s10, %s3241_s10, %s3242_s14  }
  0x76   :  { %3226 = dma.done.wait [#allocation6], 256  }
  0x77   :  { %3227 = vsyncadd [#allocation6], 4294967040 }
  0x78   :  { %3228 = dma.done.wait [#allocation9], 2048  }
  0x79   :  { %3229 = vsyncadd [#allocation9], 4294965248 }
  0x7a   :  { %3230 = dma.done.wait [#allocation12], 1024  }
  0x7b   :  { %3231 = vsyncadd [#allocation12], 4294966272 }
  0x7c   :  { %3232 = dma.done.wait [#allocation15], 1024  }
  0x7d   :  { %3233 = vsyncadd [#allocation15], 4294966272  ;;  %v3247_v0 = vmov 0.0   ;;  %v131_v1 = vld [vmem:[#allocation8 + $0x8] sm:$0xff]  ;;  %v134_v2 = vld [vmem:[#allocation8 + $0x20] sm:$0xff]  ;;  %vm159_vm0 = vcmask 261120   ;;  %v144_v34 = vlaneseq }
  0x7e   :  { %230 = vmatprep.mubr.f32.mxu0 %v3247_v0  ;;  %v130_v3 = vld [vmem:[#allocation8] sm:$0xff]  ;;  %v2763_v4 = vpack.c.bf16 %v134_v2, %v131_v1  ;;  %v133_v5 = vld [vmem:[#allocation8 + $0x18] sm:$0xff]  ;;  %v140_v7 = vld [vmem:[#allocation8 + $0x50] sm:$0xff]  ;;  %v3248_v25 = vmov 0.0|0.0   ;;  %vm3249_vm1 = vmmov 0   ;;  %s3251_s14 = smov 32  }
  0x7f   :  { %v137_v6 = vld [vmem:[#allocation8 + $0x38] sm:$0xff]  ;;  %v2765_v8 = vpack.c.bf16 %v133_v5, %v130_v3  ;;  %v132_v10 = vld [vmem:[#allocation8 + $0x10] sm:$0xff]  ;;  %v135_v11 = vld [vmem:[#allocation8 + $0x28] sm:$0xff]  ;;  %v145_v35 = vshrl.u32 %v144_v34, 7  ;;  %vm534_vm2 = vcmask 254976   ;;  %vm757_vm3 = vcmask 257026  }
  0x80   :  { %v2767_v9 = vpack.c.bf16 %v140_v7, %v137_v6  ;;  %v136_v12 = vld [vmem:[#allocation8 + $0x30] sm:$0xff]  ;;  %2764 = vmatprep.subr.bf16.mxu0 %v2763_v4  ;;  %v2771_v13 = vpack.c.bf16 %v135_v11, %v132_v10  ;;  %v139_v14 = vld [vmem:[#allocation8 + $0x48] sm:$0xff]  ;;  %v138_v16 = vld [vmem:[#allocation8 + $0x40] sm:$0xff]  ;;  %vm540_vm4 = vcmask 261126   ;;  %vm763_vm5 = vcmask 259076   ;;  %s3252_s29 = smov [#allocation17]  }
  0x81   :  { %v128_v15 = vld [vmem:[#allocation5] sm:$0xff]  ;;  %2766 = vmatpush1.bf16.msra.mxu0 %v2765_v8  ;;  %v2769_v17 = vpack.c.bf16 %v139_v14, %v136_v12  ;;  %v141_v18 = vld [vmem:[#allocation8 + $0x58] sm:$0xff]  ;;  %v324_v20 = vld [vmem:[#allocation10] sm:$0xff]  ;;  %v146_v36 = vsub.s32 0, %v145_v35  ;;  %v150_v38 = vsub.s32 1, %v145_v35  ;;  %v154_v39 = vsub.s32 2, %v145_v35 }
  0x82   :  { %2551 = vmatprep.mubr.msk.f32.mxu1 %vm159_vm0, %v128_v15  ;;  %2768 = vmatprep.subr.bf16.mxu0 %v2767_v9  ;;  %v2775_v19 = vpack.c.bf16 %v141_v18, %v138_v16  ;;  %v325_v21 = vld [vmem:[#allocation10 + $0x8] sm:$0xff]  ;;  %v328_v22 = vld [vmem:[#allocation11] sm:$0xff]  ;;  %v326_v26 = vld [vmem:[#allocation10 + $0x10] sm:$0xff]  ;;  %s2388_s11 = sshll.u32 %s3252_s29, 4  ;;  %s2389_s11 = int_to_ptr.vmem [resolvable:$true] %s2388_s11 }
  0x83   :  { %2772 = vmatprep.subr.bf16.mxu1 %v2771_v13  ;;  %v329_v23 = vld [vmem:[#allocation11 + $0x8] sm:$0xff]  ;;  %v3407_v24 = vpack.c.bf16 %v325_v21, %v324_v20  ;;  %v327_v27 = vld [vmem:[#allocation10 + $0x18] sm:$0xff]  ;;  %v330_v30 = vld [vmem:[#allocation11 + $0x10] sm:$0xff]  ;;  %s3204_s12 = scalar_lea.vmem %s2389_s11, 32  ;;  %p3209_p1 = scmp.lt.s32.totalorder %s2389_s11, %s2389_s11 }
  0x84   :  { %2774 = vmatpush3.bf16.msra.mxu1 %v2771_v13  ;;  %v129_v28 = vld [vmem:[#allocation5 + $0x8] sm:$0xff]  ;;  %v3410_v29 = vpack.c.bf16 %v329_v23, %v328_v22  ;;  %v3416_v32 = vpack.c.bf16 %v327_v27, %v326_v26  ;;  %v142_v37 = vld [vmem:[%s3737_s2] sm:$0x7]  ;;  %s3250_s2 = smov 64   ;;  %p3205_p0 = scmp.ne.s32.totalorder %s2389_s11, %s3204_s12 }
  0x85   :  { %2776 = vmatprep.subr.bf16.mxu1 %v2775_v19  ;;  %2770 = vmatpush1.bf16.msra.mxu0 %v2769_v17  ;;  %v331_v31 = vld [vmem:[#allocation11 + $0x18] sm:$0xff]  ;;  %v147_v40 = vrot.slane %v142_v37, %v146_v36  ;;  %v151_v41 = vrot.slane %v142_v37, %v150_v38  ;;  %v155_v42 = vrot.slane %v142_v37, %v154_v39  ;;  %p3210_p2 = scmp.lt.s32.totalorder %s3204_s12, %s3204_s12 }
  0x86   :  { %2779 = vmatprep.subr.bf16.mxu0 %v3248_v25  ;;  %v3421_v33 = vpack.c.bf16 %v331_v31, %v330_v30 }
  0x87   :  { %p3211_p3 = por %p3210_p2, %p3209_p1 }
  0x88   :  { %2778 = vmatpush3.bf16.msra.mxu1 %v2775_v19  ;;  %2400 = vmatmul.mubr.msk.f32.vlgmr.msra.gmra.mrb[0].mxu0 %vm159_vm0, %v128_v15 }
  0x89   :  { %2785 = vmatprep.subr.bf16.mxu1 %v3248_v25  ;;  %236 = vmatprep.mubr.f32.mxu0 %v3247_v0  ;;  %p3212_p4 = pnand %p3211_p3, %p3205_p0 }
  0x8a   :  { %2781 = vmatpush3.bf16.msra.mxu0 %v3407_v24 }
  0x8b   :  { %2552 = vmatmul.mubr.msk.f32.vlgmr.msra.gmra.mrb[0].mxu1 %vm159_vm0, %v129_v28  ;;  %2782 = vmatprep.subr.bf16.mxu0 %v3248_v25 }
  0x8c   :  { %2787 = vmatpush3.bf16.msra.mxu1 %v3410_v29  ;;  %2573 = vmatprep.mubr.msk.f32.mxu1 %vm3249_vm1, %v3247_v0 }
  0x8d   :  { %2401 = vmatmul.mubr.msk.f32.gmra.mrb[2].mxu0 %vm159_vm0, %v129_v28  ;;  %2788 = vmatprep.subr.bf16.mxu1 %v3248_v25 }
  0x8e   :  { %2784 = vmatpush3.bf16.msra.mxu0 %v3416_v32  ;;  %2562 = vmatprep.mubr.msk.f32.mxu0 %vm3249_vm1, %v3247_v0 }
  0x8f   :  { %2791 = vmatprep.subr.bf16.mxu0 %v3248_v25 }
  0x90   :  { %2790 = vmatpush3.bf16.msra.mxu1 %v3421_v33 }
  0x91   :  { %2563 = vmatmul.mubr.f32.vlgmr.msra.gmra.mrb[4].mxu0 %v3247_v0  ;;  %2797 = vmatprep.subr.bf16.mxu1 %v3248_v25 }
  0x92   :  { %2793 = vmatpush3.bf16.msra.mxu0 %v3407_v24  ;;  %2584 = vmatprep.mubr.msk.f32.mxu0 %vm3249_vm1, %v3247_v0 }
  0x93   :  { %2574 = vmatmul.mubr.f32.vlgmr.msra.gmra.mrb[2].mxu1 %v3247_v0  ;;  %2794 = vmatprep.subr.bf16.mxu0 %v3248_v25 }
  0x94   :  { %2799 = vmatpush3.bf16.msra.mxu1 %v3410_v29  ;;  %2595 = vmatprep.mubr.msk.f32.mxu1 %vm3249_vm1, %v3247_v0 }
  0x95   :  { %2800 = vmatprep.subr.bf16.mxu1 %v3248_v25 }
  0x96   :  { %2796 = vmatpush3.bf16.msra.mxu0 %v3416_v32 }
  0x97   :  { %2803 = vmatprep.subr.bf16.mxu0 %v3248_v25 }
  0x98   :  { %2802 = vmatpush3.bf16.msra.mxu1 %v3421_v33 }
  0x99   :  { %2809 = vmatprep.subr.bf16.mxu1 %v3248_v25 }
 0x15b   :  { %v232_v43 = vpop.f32.mrb[0].mxu0 }
 0x15c   :  { %v233_v44 = vadd.f32 %v232_v43, %v147_v40  ;;  %v234_v45 = vpop.f32.mrb[1].mxu0 }
 0x15d   :  { %v235_v46 = vadd.f32 %v234_v45, %v151_v41 }
 0x15e   :  { %v2553_v47 = vpop.f32.mrb[0].mxu1  ;;  %318 = vst [vmem:[#allocation2] sm:$0xff] %v233_v44 }
 0x15f   :  { %v315_v48 = vadd.f32 %v2553_v47, %v155_v42  ;;  %v309_v49 = vpop.f32.mrb[1].mxu1  ;;  %319 = vst [vmem:[#allocation2 + $0x8] sm:$0xff] %v235_v46 }
 0x160   :  { %v238_v50 = vpop.f32.mrb[2].mxu0  ;;  %v310_v51 = vadd.f32 %v309_v49, %v155_v42 }
 0x161   :  { %v239_v52 = vadd.f32 %v238_v50, %v147_v40  ;;  %v240_v53 = vpop.f32.mrb[3].mxu0  ;;  %323 = vst.msk [vmem:[#allocation2 + $0x28] sm:$0xff] %vm159_vm0, %v315_v48 }
 0x162   :  { %v241_v54 = vadd.f32 %v240_v53, %v151_v41  ;;  %320 = vst.msk [vmem:[#allocation2 + $0x10] sm:$0xff] %vm159_vm0, %v310_v51 }
 0x163   :  { %321 = vst [vmem:[#allocation2 + $0x18] sm:$0xff] %v239_v52 }
 0x164   :  { %322 = vst [vmem:[#allocation2 + $0x20] sm:$0xff] %v241_v54  ;;  %v402_v55 = vpop.f32.mrb[4].mxu0 }
 0x165   :  { %v2564_v56 = vpop.f32.mrb[5].mxu0  ;;  %v332_v57 = vld [vmem:[#allocation2] sm:$0x3]  ;;  %v542_v38 = vld [vmem:[#allocation2] sm:$0xc] }
 0x166   :  { %v474_v58 = vpop.f32.mrb[2].mxu1  ;;  %v406_v59 = vadd.f32 %v402_v55, %v332_v57 }
 0x167   :  { %v2575_v60 = vpop.f32.mrb[3].mxu1  ;;  %v479_v61 = vrot.slane %v474_v58, 2 }
 0x168   :  { %2918 = vtanh.f32 %v406_v59  ;;  %v2404_v3 = vmul.f32 -1.442695, %v406_v59 }
 0x16b   :  { %v407_v62 = vld [vmem:[#allocation2 + $0x20] sm:$0xc0]  ;;  %v619_v43 = vld [vmem:[#allocation2 + $0x20] sm:$0x30] }
 0x16c   :  { %v481_v63 = vadd.f32 %v479_v61, %v407_v62 }
 0x16e   :  { %2920 = vtanh.f32 %v481_v63  ;;  %v2405_v4 = vmul.f32 -1.442695, %v481_v63 }
 0x16f   :  { %2922 = vpow2.f32 %v2404_v3 }
 0x170   :  { %2924 = vpow2.f32 %v2405_v4 }
 0x172   :  { %v2919_v1 = vpop.eup %2918 }
 0x173   :  { %491 = vrot.lane.b32.xlu0 %v2919_v1, %s3250_s2 }
 0x178   :  { %v2921_v2 = vpop.eup %2920 }
 0x179   :  { %515 = vrot.lane.b32.xlu0 %v2921_v2, %s3250_s2  ;;  %v2923_v5 = vpop.eup %2922 }
 0x17a   :  { %v485_v6 = vadd.f32 1.0, %v2923_v5  ;;  %v2925_v7 = vpop.eup %2924 }
 0x17b   :  { %v509_v8 = vadd.f32 1.0, %v2925_v7 }
 0x17c   :  { %2926 = vrcp.f32 %v485_v6 }
 0x17d   :  { %2928 = vrcp.f32 %v509_v8 }
 0x186   :  { %v2927_v9 = vpop.eup %2926 }
 0x187   :  { %v2929_v12 = vpop.eup %2928  ;;  %v489_v15 = vmul.f32 0.0, %v2927_v9 }
 0x188   :  { %v513_v18 = vmul.f32 0.0, %v2929_v12 }
 0x1e5   :  { %v492_v10 = vpop.permute.xlu0 %491 }
 0x1e6   :  { %v494_v11 = vmul.f32 %v2927_v9, %v492_v10 }
 0x1e8   :  { %496 = vrot.lane.b32.xlu1 %v494_v11, %s3251_s14 }
 0x1eb   :  { %v516_v13 = vpop.permute.xlu0 %515 }
 0x1ec   :  { %v518_v14 = vmul.f32 %v2929_v12, %v516_v13 }
 0x1ee   :  { %520 = vrot.lane.b32.xlu1 %v518_v14, %s3251_s14 }
 0x25a   :  { %v497_v16 = vpop.permute.xlu1 %496 }
 0x25b   :  { %v3456_v17 = vadd.f32 %v497_v16, %v489_v15 }
 0x25d   :  { %2930 = vtanh.f32 %v3456_v17  ;;  %v707_v59 = vrot.slane %v3456_v17, 6  ;;  %v765_v17 = vld [vmem:[#allocation2] sm:$0x30] }
 0x260   :  { %v521_v19 = vpop.permute.xlu1 %520 }
 0x261   :  { %v3459_v20 = vadd.f32 %v521_v19, %v513_v18 }
 0x263   :  { %2932 = vtanh.f32 %v3459_v20  ;;  %v734_v63 = vrot.slane %v3459_v20, 2 }
 0x267   :  { %v2931_v21 = vpop.eup %2930 }
 0x268   :  { %502 = vrot.lane.b32.xlu0 %v2931_v21, %s3250_s2 }
 0x26d   :  { %v2933_v22 = vpop.eup %2932 }
 0x26e   :  { %526 = vrot.lane.b32.xlu1 %v2933_v22, %s3250_s2  ;;  %v845_v22 = vld [vmem:[#allocation2 + $0x20] sm:$0xc] }
 0x2da   :  { %v503_v23 = vpop.permute.xlu0 %502 }
 0x2db   :  { %v505_v26 = vmul.f32 %v2927_v9, %v503_v23 }
 0x2dd   :  { %531 = vrot.lane.b32.xlu0 %v505_v26, %s3251_s14 }
 0x2e0   :  { %v527_v27 = vpop.permute.xlu1 %526 }
 0x2e1   :  { %v3465_v28 = vmul.f32 %v2929_v12, %v527_v27 }
 0x2e3   :  { %v620_v30 = vrot.slane %v3465_v28, 6 }
 0x2e5   :  { %621 = vrot.lane.b32.xlu1 %v620_v30, %s3251_s14 }
 0x34f   :  { %v532_v31 = vpop.permute.xlu0 %531 }
 0x350   :  { %535 = vst.msk [vmem:[#allocation3] sm:$0x3] %vm534_vm2, %v532_v31  ;;  %2585 = vmatmul.mubr.msk.f32.vlgmr.msra.gmra.mrb[6].mxu0 %vm159_vm0, %v532_v31 }
 0x351   :  { %2805 = vmatpush3.bf16.msra.mxu0 %v3407_v24  ;;  %2606 = vmatprep.mubr.msk.f32.mxu0 %vm3249_vm1, %v3247_v0 }
 0x352   :  { %2806 = vmatprep.subr.bf16.mxu0 %v3248_v25 }
 0x355   :  { %2808 = vmatpush3.bf16.msra.mxu0 %v3416_v32 }
 0x356   :  { %2815 = vmatprep.subr.bf16.mxu0 %v3248_v25 }
 0x357   :  { %v622_v34 = vpop.permute.xlu1 %621 }
 0x358   :  { %2596 = vmatmul.mubr.msk.f32.vlgmr.msra.gmra.mrb[4].mxu1 %vm159_vm0, %v622_v34 }
 0x359   :  { %2811 = vmatpush3.bf16.msra.mxu1 %v3410_v29  ;;  %2617 = vmatprep.mubr.msk.f32.mxu1 %vm3249_vm1, %v3247_v0 }
 0x35a   :  { %2812 = vmatprep.subr.bf16.mxu1 %v3248_v25 }
 0x35d   :  { %2814 = vmatpush3.bf16.msra.mxu1 %v3421_v33 }
 0x35e   :  { %2821 = vmatprep.subr.bf16.mxu1 %v3248_v25 }
 0x423   :  { %v611_v35 = vpop.f32.mrb[6].mxu0 }
 0x424   :  { %v616_v36 = vrot.slane %v611_v35, 6  ;;  %v2586_v37 = vpop.f32.mrb[7].mxu0 }
 0x426   :  { %v618_v39 = vadd.f32 %v616_v36, %v542_v38 }
 0x428   :  { %2934 = vtanh.f32 %v618_v39  ;;  %v2408_v47 = vmul.f32 -1.442695, %v618_v39 }
 0x42b   :  { %v691_v40 = vpop.f32.mrb[4].mxu1 }
 0x42c   :  { %v696_v41 = vrot.slane %v691_v40, 4  ;;  %v2597_v42 = vpop.f32.mrb[5].mxu1 }
 0x42e   :  { %v698_v44 = vadd.f32 %v696_v41, %v619_v43 }
 0x430   :  { %2936 = vtanh.f32 %v698_v44  ;;  %v2409_v48 = vmul.f32 -1.442695, %v698_v44 }
 0x431   :  { %2938 = vpow2.f32 %v2408_v47 }
 0x432   :  { %v2935_v45 = vpop.eup %2934  ;;  %2940 = vpow2.f32 %v2409_v48 }
 0x433   :  { %711 = vrot.lane.b32.xlu0 %v2935_v45, %s3250_s2 }
 0x43a   :  { %v2937_v46 = vpop.eup %2936 }
 0x43b   :  { %738 = vrot.lane.b32.xlu1 %v2937_v46, %s3250_s2  ;;  %v2939_v49 = vpop.eup %2938 }
 0x43c   :  { %v702_v50 = vadd.f32 1.0, %v2939_v49  ;;  %v2941_v51 = vpop.eup %2940 }
 0x43d   :  { %v729_v52 = vadd.f32 1.0, %v2941_v51 }
 0x43e   :  { %2942 = vrcp.f32 %v702_v50 }
 0x43f   :  { %2944 = vrcp.f32 %v729_v52 }
 0x448   :  { %v2943_v53 = vpop.eup %2942 }
 0x449   :  { %v2945_v56 = vpop.eup %2944  ;;  %v709_v60 = vmul.f32 %v2943_v53, %v707_v59 }
 0x44a   :  { %v736_v1 = vmul.f32 %v2945_v56, %v734_v63 }
 0x4a5   :  { %v712_v54 = vpop.permute.xlu0 %711 }
 0x4a6   :  { %v714_v55 = vmul.f32 %v2943_v53, %v712_v54 }
 0x4a8   :  { %716 = vrot.lane.b32.xlu0 %v714_v55, %s3251_s14 }
 0x4ad   :  { %v739_v57 = vpop.permute.xlu1 %738 }
 0x4ae   :  { %v741_v58 = vmul.f32 %v2945_v56, %v739_v57 }
 0x4b0   :  { %743 = vrot.lane.b32.xlu1 %v741_v58, %s3251_s14 }
 0x51a   :  { %v717_v61 = vpop.permute.xlu0 %716 }
 0x51b   :  { %v3489_v62 = vadd.f32 %v717_v61, %v709_v60 }
 0x51d   :  { %2946 = vtanh.f32 %v3489_v62  ;;  %v933_v44 = vrot.slane %v3489_v62, 6 }
 0x522   :  { %v744_v2 = vpop.permute.xlu1 %743 }
 0x523   :  { %v3493_v3 = vadd.f32 %v744_v2, %v736_v1  ;;  %v989_v2 = vld [vmem:[#allocation2] sm:$0xc0] }
 0x525   :  { %2948 = vtanh.f32 %v3493_v3  ;;  %v960_v48 = vrot.slane %v3493_v3, 2 }
 0x527   :  { %v2947_v4 = vpop.eup %2946 }
 0x528   :  { %722 = vrot.lane.b32.xlu0 %v2947_v4, %s3250_s2  ;;  %v1069_v4 = vld [vmem:[#allocation2 + $0x20] sm:$0x3] }
 0x52f   :  { %v2949_v5 = vpop.eup %2948 }
 0x530   :  { %749 = vrot.lane.b32.xlu1 %v2949_v5, %s3250_s2 }
 0x59a   :  { %v723_v6 = vpop.permute.xlu0 %722 }
 0x59b   :  { %v3498_v7 = vmul.f32 %v2943_v53, %v723_v6 }
 0x59d   :  { %v766_v8 = vrot.slane %v3498_v7, 2 }
 0x59f   :  { %767 = vrot.lane.b32.xlu0 %v766_v8, %s3251_s14 }
 0x5a2   :  { %v750_v9 = vpop.permute.xlu1 %749 }
 0x5a3   :  { %v3502_v10 = vmul.f32 %v2945_v56, %v750_v9 }
 0x5a5   :  { %v846_v11 = vrot.slane %v3502_v10, 4 }
 0x5a7   :  { %847 = vrot.lane.b32.xlu1 %v846_v11, %s3251_s14 }
 0x611   :  { %v768_v12 = vpop.permute.xlu0 %767 }
 0x612   :  { %2607 = vmatmul.mubr.msk.f32.vlgmr.msra.gmra.mrb[8].mxu0 %vm159_vm0, %v768_v12 }
 0x613   :  { %2817 = vmatpush3.bf16.msra.mxu0 %v3407_v24  ;;  %2628 = vmatprep.mubr.msk.f32.mxu0 %vm3249_vm1, %v3247_v0 }
 0x614   :  { %2818 = vmatprep.subr.bf16.mxu0 %v3248_v25 }
 0x617   :  { %2820 = vmatpush3.bf16.msra.mxu0 %v3416_v32 }
 0x618   :  { %2827 = vmatprep.subr.bf16.mxu0 %v3248_v25 }
 0x619   :  { %v848_v13 = vpop.permute.xlu1 %847 }
 0x61a   :  { %2618 = vmatmul.mubr.msk.f32.vlgmr.msra.gmra.mrb[6].mxu1 %vm159_vm0, %v848_v13 }
 0x61b   :  { %2823 = vmatpush3.bf16.msra.mxu1 %v3410_v29  ;;  %2639 = vmatprep.mubr.msk.f32.mxu1 %vm3249_vm1, %v3247_v0 }
 0x61c   :  { %2824 = vmatprep.subr.bf16.mxu1 %v3248_v25 }
 0x61f   :  { %2826 = vmatpush3.bf16.msra.mxu1 %v3421_v33 }
 0x620   :  { %2833 = vmatprep.subr.bf16.mxu1 %v3248_v25 }
 0x6e5   :  { %v837_v14 = vpop.f32.mrb[8].mxu0 }
 0x6e6   :  { %v842_v15 = vrot.slane %v837_v14, 4  ;;  %v2608_v16 = vpop.f32.mrb[9].mxu0 }
 0x6e8   :  { %v844_v18 = vadd.f32 %v842_v15, %v765_v17 }
 0x6ea   :  { %2950 = vtanh.f32 %v844_v18  ;;  %v2412_v30 = vmul.f32 -1.442695, %v844_v18 }
 0x6ed   :  { %v917_v19 = vpop.f32.mrb[6].mxu1 }
 0x6ee   :  { %v922_v20 = vrot.slane %v917_v19, 6  ;;  %v2619_v21 = vpop.f32.mrb[7].mxu1 }
 0x6f0   :  { %v924_v23 = vadd.f32 %v922_v20, %v845_v22 }
 0x6f2   :  { %2952 = vtanh.f32 %v924_v23  ;;  %v2413_v31 = vmul.f32 -1.442695, %v924_v23 }
 0x6f3   :  { %2954 = vpow2.f32 %v2412_v30 }
 0x6f4   :  { %v2951_v26 = vpop.eup %2950  ;;  %2956 = vpow2.f32 %v2413_v31 }
 0x6f5   :  { %937 = vrot.lane.b32.xlu0 %v2951_v26, %s3250_s2 }
 0x6fc   :  { %v2953_v27 = vpop.eup %2952 }
 0x6fd   :  { %964 = vrot.lane.b32.xlu1 %v2953_v27, %s3250_s2  ;;  %v2955_v34 = vpop.eup %2954 }
 0x6fe   :  { %v928_v35 = vadd.f32 1.0, %v2955_v34  ;;  %v2957_v36 = vpop.eup %2956 }
 0x6ff   :  { %v955_v37 = vadd.f32 1.0, %v2957_v36 }
 0x700   :  { %2958 = vrcp.f32 %v928_v35 }
 0x701   :  { %2960 = vrcp.f32 %v955_v37 }
 0x70a   :  { %v2959_v38 = vpop.eup %2958 }
 0x70b   :  { %v2961_v41 = vpop.eup %2960  ;;  %v935_v45 = vmul.f32 %v2959_v38, %v933_v44 }
 0x70c   :  { %v962_v49 = vmul.f32 %v2961_v41, %v960_v48 }
 0x767   :  { %v938_v39 = vpop.permute.xlu0 %937 }
 0x768   :  { %v940_v40 = vmul.f32 %v2959_v38, %v938_v39 }
 0x76a   :  { %942 = vrot.lane.b32.xlu0 %v940_v40, %s3251_s14 }
 0x76f   :  { %v965_v42 = vpop.permute.xlu1 %964 }
 0x770   :  { %v967_v43 = vmul.f32 %v2961_v41, %v965_v42 }
 0x772   :  { %969 = vrot.lane.b32.xlu1 %v967_v43, %s3251_s14 }
 0x7dc   :  { %v943_v46 = vpop.permute.xlu0 %942 }
 0x7dd   :  { %v3525_v47 = vadd.f32 %v943_v46, %v935_v45 }
 0x7df   :  { %2962 = vtanh.f32 %v3525_v47  ;;  %v1154_v26 = vrot.slane %v3525_v47, 6  ;;  %v1210_v47 = vld [vmem:[#allocation2 + $0x18] sm:$0x3] }
 0x7e4   :  { %v970_v50 = vpop.permute.xlu1 %969 }
 0x7e5   :  { %v3529_v51 = vadd.f32 %v970_v50, %v962_v49 }
 0x7e7   :  { %2964 = vtanh.f32 %v3529_v51  ;;  %v1181_v34 = vrot.slane %v3529_v51, 2 }
 0x7e9   :  { %v2963_v52 = vpop.eup %2962 }
 0x7ea   :  { %948 = vrot.lane.b32.xlu0 %v2963_v52, %s3250_s2 }
 0x7f1   :  { %v2965_v53 = vpop.eup %2964 }
 0x7f2   :  { %975 = vrot.lane.b32.xlu1 %v2965_v53, %s3250_s2 }
 0x85c   :  { %v949_v54 = vpop.permute.xlu0 %948 }
 0x85d   :  { %v3534_v55 = vmul.f32 %v2959_v38, %v949_v54  ;;  %v1287_v54 = vld [vmem:[#allocation2 + $0x8] sm:$0xc0] }
 0x85f   :  { %v990_v56 = vrot.slane %v3534_v55, 4 }
 0x861   :  { %991 = vrot.lane.b32.xlu0 %v990_v56, %s3251_s14 }
 0x864   :  { %v976_v57 = vpop.permute.xlu1 %975 }
 0x865   :  { %v3538_v58 = vmul.f32 %v2961_v41, %v976_v57 }
 0x867   :  { %v1070_v59 = vrot.slane %v3538_v58, 2 }
 0x869   :  { %1071 = vrot.lane.b32.xlu1 %v1070_v59, %s3251_s14 }
 0x8d3   :  { %v992_v60 = vpop.permute.xlu0 %991 }
 0x8d4   :  { %2629 = vmatmul.mubr.msk.f32.vlgmr.msra.gmra.mrb[10].mxu0 %vm159_vm0, %v992_v60 }
 0x8d5   :  { %2829 = vmatpush3.bf16.msra.mxu0 %v3407_v24  ;;  %2650 = vmatprep.mubr.msk.f32.mxu0 %vm3249_vm1, %v3247_v0 }
 0x8d6   :  { %2830 = vmatprep.subr.bf16.mxu0 %v3248_v25 }
 0x8d9   :  { %2832 = vmatpush3.bf16.msra.mxu0 %v3416_v32 }
 0x8da   :  { %2839 = vmatprep.subr.bf16.mxu0 %v3248_v25 }
 0x8db   :  { %v1072_v61 = vpop.permute.xlu1 %1071 }
 0x8dc   :  { %2640 = vmatmul.mubr.msk.f32.vlgmr.msra.gmra.mrb[8].mxu1 %vm159_vm0, %v1072_v61 }
 0x8dd   :  { %2835 = vmatpush3.bf16.msra.mxu1 %v3410_v29  ;;  %2661 = vmatprep.mubr.msk.f32.mxu1 %vm3249_vm1, %v3247_v0 }
 0x8de   :  { %2836 = vmatprep.subr.bf16.mxu1 %v3248_v25 }
 0x8e1   :  { %2838 = vmatpush3.bf16.msra.mxu1 %v3421_v33 }
 0x8e2   :  { %2845 = vmatprep.subr.bf16.mxu1 %v3248_v25 }
 0x9a7   :  { %v1061_v62 = vpop.f32.mrb[10].mxu0 }
 0x9a8   :  { %v1066_v63 = vrot.slane %v1061_v62, 2  ;;  %v2630_v1 = vpop.f32.mrb[11].mxu0 }
 0x9aa   :  { %v1068_v3 = vadd.f32 %v1066_v63, %v989_v2 }
 0x9ac   :  { %2966 = vtanh.f32 %v1068_v3  ;;  %v2416_v12 = vmul.f32 -1.442695, %v1068_v3 }
 0x9af   :  { %v1141_v5 = vpop.f32.mrb[8].mxu1 }
 0x9b0   :  { %v1145_v6 = vadd.f32 %v1141_v5, %v1069_v4  ;;  %v2641_v8 = vpop.f32.mrb[9].mxu1 }
 0x9b2   :  { %2968 = vtanh.f32 %v1145_v6  ;;  %v2417_v13 = vmul.f32 -1.442695, %v1145_v6 }
 0x9b3   :  { %2970 = vpow2.f32 %v2416_v12 }
 0x9b4   :  { %2972 = vpow2.f32 %v2417_v13 }
 0x9b6   :  { %v2967_v9 = vpop.eup %2966 }
 0x9b7   :  { %1158 = vrot.lane.b32.xlu0 %v2967_v9, %s3250_s2 }
 0x9bc   :  { %v2969_v11 = vpop.eup %2968 }
 0x9bd   :  { %1185 = vrot.lane.b32.xlu1 %v2969_v11, %s3250_s2  ;;  %v2971_v14 = vpop.eup %2970 }
 0x9be   :  { %v1149_v15 = vadd.f32 1.0, %v2971_v14  ;;  %v2973_v16 = vpop.eup %2972 }
 0x9bf   :  { %v1176_v17 = vadd.f32 1.0, %v2973_v16 }
 0x9c0   :  { %2974 = vrcp.f32 %v1149_v15 }
 0x9c1   :  { %2976 = vrcp.f32 %v1176_v17 }
 0x9ca   :  { %v2975_v18 = vpop.eup %2974 }
 0x9cb   :  { %v2977_v21 = vpop.eup %2976  ;;  %v1156_v27 = vmul.f32 %v2975_v18, %v1154_v26 }
 0x9cc   :  { %v1183_v35 = vmul.f32 %v2977_v21, %v1181_v34 }
 0xa29   :  { %v1159_v19 = vpop.permute.xlu0 %1158 }
 0xa2a   :  { %v1161_v20 = vmul.f32 %v2975_v18, %v1159_v19 }
 0xa2c   :  { %1163 = vrot.lane.b32.xlu0 %v1161_v20, %s3251_s14 }
 0xa2f   :  { %v1186_v22 = vpop.permute.xlu1 %1185 }
 0xa30   :  { %v1188_v23 = vmul.f32 %v2977_v21, %v1186_v22 }
 0xa32   :  { %1190 = vrot.lane.b32.xlu1 %v1188_v23, %s3251_s14 }
 0xa9e   :  { %v1164_v30 = vpop.permute.xlu0 %1163 }
 0xa9f   :  { %v3561_v31 = vadd.f32 %v1164_v30, %v1156_v27 }
 0xaa1   :  { %2978 = vtanh.f32 %v3561_v31  ;;  %v1372_v11 = vrot.slane %v3561_v31, 6 }
 0xaa4   :  { %v1191_v36 = vpop.permute.xlu1 %1190 }
 0xaa5   :  { %v3565_v37 = vadd.f32 %v1191_v36, %v1183_v35 }
 0xaa7   :  { %2980 = vtanh.f32 %v3565_v37  ;;  %v1399_v15 = vrot.slane %v3565_v37, 2  ;;  %v1428_v37 = vld [vmem:[#allocation2 + $0x18] sm:$0xc] }
 0xaab   :  { %v2979_v38 = vpop.eup %2978 }
 0xaac   :  { %1169 = vrot.lane.b32.xlu0 %v2979_v38, %s3250_s2 }
 0xab1   :  { %v2981_v39 = vpop.eup %2980 }
 0xab2   :  { %1196 = vrot.lane.b32.xlu1 %v2981_v39, %s3250_s2 }
 0xb1e   :  { %v1170_v40 = vpop.permute.xlu0 %1169 }
 0xb1f   :  { %v3570_v41 = vmul.f32 %v2975_v18, %v1170_v40 }
 0xb21   :  { %v1211_v42 = vrot.slane %v3570_v41, 6 }
 0xb23   :  { %1212 = vrot.lane.b32.xlu0 %v1211_v42, %s3251_s14 }
 0xb24   :  { %v1197_v43 = vpop.permute.xlu1 %1196 }
 0xb25   :  { %v1199_v44 = vmul.f32 %v2977_v21, %v1197_v43  ;;  %v1505_v43 = vld [vmem:[#allocation2 + $0x8] sm:$0x30] }
 0xb27   :  { %1206 = vrot.lane.b32.xlu1 %v1199_v44, %s3251_s14 }
 0xb95   :  { %v1213_v45 = vpop.permute.xlu0 %1212 }
 0xb96   :  { %2651 = vmatmul.mubr.msk.f32.vlgmr.msra.gmra.mrb[12].mxu0 %vm159_vm0, %v1213_v45 }
 0xb97   :  { %2841 = vmatpush3.bf16.msra.mxu0 %v3407_v24  ;;  %2672 = vmatprep.mubr.msk.f32.mxu0 %vm3249_vm1, %v3247_v0 }
 0xb98   :  { %2842 = vmatprep.subr.bf16.mxu0 %v3248_v25 }
 0xb99   :  { %v1207_v46 = vpop.permute.xlu1 %1206 }
 0xb9a   :  { %1209 = vst.msk [vmem:[#allocation4 + $0x8] sm:$0x3] %vm534_vm2, %v1207_v46  ;;  %2662 = vmatmul.mubr.msk.f32.vlgmr.msra.gmra.mrb[10].mxu1 %vm159_vm0, %v1207_v46 }
 0xb9b   :  { %2847 = vmatpush3.bf16.msra.mxu1 %v3410_v29  ;;  %2683 = vmatprep.mubr.msk.f32.mxu1 %vm3249_vm1, %v3247_v0 }
 0xb9c   :  { %2844 = vmatpush3.bf16.msra.mxu0 %v3416_v32  ;;  %2848 = vmatprep.subr.bf16.mxu1 %v3248_v25 }
 0xb9d   :  { %2851 = vmatprep.subr.bf16.mxu0 %v3248_v25 }
 0xb9f   :  { %2850 = vmatpush3.bf16.msra.mxu1 %v3421_v33 }
 0xba0   :  { %2857 = vmatprep.subr.bf16.mxu1 %v3248_v25 }
 0xc69   :  { %v1282_v48 = vpop.f32.mrb[12].mxu0 }
 0xc6a   :  { %v1286_v49 = vadd.f32 %v1282_v48, %v1210_v47  ;;  %v2652_v50 = vpop.f32.mrb[13].mxu0 }
 0xc6c   :  { %2982 = vtanh.f32 %v1286_v49  ;;  %v2420_v60 = vmul.f32 -1.442695, %v1286_v49 }
 0xc6d   :  { %v1356_v51 = vpop.f32.mrb[10].mxu1 }
 0xc6e   :  { %v1361_v52 = vrot.slane %v1356_v51, 2  ;;  %v2663_v53 = vpop.f32.mrb[11].mxu1 }
 0xc70   :  { %v1363_v56 = vadd.f32 %v1361_v52, %v1287_v54 }
 0xc72   :  { %2984 = vtanh.f32 %v1363_v56  ;;  %v2421_v61 = vmul.f32 -1.442695, %v1363_v56 }
 0xc73   :  { %2986 = vpow2.f32 %v2420_v60 }
 0xc74   :  { %2988 = vpow2.f32 %v2421_v61 }
 0xc76   :  { %v2983_v57 = vpop.eup %2982 }
 0xc77   :  { %1376 = vrot.lane.b32.xlu0 %v2983_v57, %s3250_s2 }
 0xc7c   :  { %v2985_v59 = vpop.eup %2984 }
 0xc7d   :  { %1403 = vrot.lane.b32.xlu1 %v2985_v59, %s3250_s2  ;;  %v2987_v62 = vpop.eup %2986 }
 0xc7e   :  { %v1367_v63 = vadd.f32 1.0, %v2987_v62  ;;  %v2989_v1 = vpop.eup %2988 }
 0xc7f   :  { %v1394_v2 = vadd.f32 1.0, %v2989_v1 }
 0xc80   :  { %2990 = vrcp.f32 %v1367_v63 }
 0xc81   :  { %2992 = vrcp.f32 %v1394_v2 }
 0xc8a   :  { %v2991_v3 = vpop.eup %2990 }
 0xc8b   :  { %v2993_v6 = vpop.eup %2992  ;;  %v1374_v12 = vmul.f32 %v2991_v3, %v1372_v11 }
 0xc8c   :  { %v1401_v16 = vmul.f32 %v2993_v6, %v1399_v15 }
 0xce9   :  { %v1377_v4 = vpop.permute.xlu0 %1376 }
 0xcea   :  { %v1379_v5 = vmul.f32 %v2991_v3, %v1377_v4 }
 0xcec   :  { %1381 = vrot.lane.b32.xlu0 %v1379_v5, %s3251_s14 }
 0xcef   :  { %v1404_v8 = vpop.permute.xlu1 %1403 }
 0xcf0   :  { %v1406_v9 = vmul.f32 %v2993_v6, %v1404_v8 }
 0xcf2   :  { %1408 = vrot.lane.b32.xlu1 %v1406_v9, %s3251_s14 }
 0xd5e   :  { %v1382_v13 = vpop.permute.xlu0 %1381 }
 0xd5f   :  { %v3595_v14 = vadd.f32 %v1382_v13, %v1374_v12 }
 0xd61   :  { %2994 = vtanh.f32 %v3595_v14  ;;  %v1593_v61 = vrot.slane %v3595_v14, 6 }
 0xd64   :  { %v1409_v17 = vpop.permute.xlu1 %1408 }
 0xd65   :  { %v3599_v18 = vadd.f32 %v1409_v17, %v1401_v16 }
 0xd67   :  { %2996 = vtanh.f32 %v3599_v18  ;;  %v1620_v2 = vrot.slane %v3599_v18, 2 }
 0xd6b   :  { %v2995_v19 = vpop.eup %2994 }
 0xd6c   :  { %1387 = vrot.lane.b32.xlu0 %v2995_v19, %s3250_s2 }
 0xd71   :  { %v2997_v20 = vpop.eup %2996 }
 0xd72   :  { %1414 = vrot.lane.b32.xlu1 %v2997_v20, %s3250_s2  ;;  %v1649_v20 = vld [vmem:[#allocation2 + $0x18] sm:$0x30] }
 0xdde   :  { %v1388_v21 = vpop.permute.xlu0 %1387 }
 0xddf   :  { %v1390_v22 = vmul.f32 %v2991_v3, %v1388_v21 }
 0xde1   :  { %1419 = vrot.lane.b32.xlu0 %v1390_v22, %s3251_s14 }
 0xde4   :  { %v1415_v23 = vpop.permute.xlu1 %1414 }
 0xde5   :  { %v3605_v26 = vmul.f32 %v2993_v6, %v1415_v23 }
 0xde7   :  { %v1506_v27 = vrot.slane %v3605_v26, 6 }
 0xde9   :  { %1507 = vrot.lane.b32.xlu1 %v1506_v27, %s3251_s14  ;;  %v1729_v27 = vld [vmem:[#allocation2 + $0x8] sm:$0xc] }
 0xe53   :  { %v1420_v30 = vpop.permute.xlu0 %1419 }
 0xe54   :  { %1422 = vst.msk [vmem:[#allocation3 + $0x8] sm:$0x3] %vm534_vm2, %v1420_v30  ;;  %2673 = vmatmul.mubr.msk.f32.vlgmr.msra.gmra.mrb[14].mxu0 %vm159_vm0, %v1420_v30 }
 0xe55   :  { %2853 = vmatpush3.bf16.msra.mxu0 %v3407_v24  ;;  %2694 = vmatprep.mubr.msk.f32.mxu0 %vm3249_vm1, %v3247_v0 }
 0xe56   :  { %2854 = vmatprep.subr.bf16.mxu0 %v3248_v25 }
 0xe59   :  { %2856 = vmatpush3.bf16.msra.mxu0 %v3416_v32 }
 0xe5a   :  { %2863 = vmatprep.subr.bf16.mxu0 %v3248_v25 }
 0xe5b   :  { %v1508_v31 = vpop.permute.xlu1 %1507 }
 0xe5c   :  { %2684 = vmatmul.mubr.msk.f32.vlgmr.msra.gmra.mrb[12].mxu1 %vm159_vm0, %v1508_v31 }
 0xe5d   :  { %2859 = vmatpush3.bf16.msra.mxu1 %v3410_v29  ;;  %2705 = vmatprep.mubr.msk.f32.mxu1 %vm3249_vm1, %v3247_v0 }
 0xe5e   :  { %2860 = vmatprep.subr.bf16.mxu1 %v3248_v25 }
 0xe61   :  { %2862 = vmatpush3.bf16.msra.mxu1 %v3421_v33 }
 0xe62   :  { %2869 = vmatprep.subr.bf16.mxu1 %v3248_v25 }
 0xf27   :  { %v1497_v34 = vpop.f32.mrb[14].mxu0 }
 0xf28   :  { %v1502_v35 = vrot.slane %v1497_v34, 6  ;;  %v2674_v36 = vpop.f32.mrb[15].mxu0 }
 0xf2a   :  { %v1504_v38 = vadd.f32 %v1502_v35, %v1428_v37 }
 0xf2c   :  { %2998 = vtanh.f32 %v1504_v38  ;;  %v2424_v47 = vmul.f32 -1.442695, %v1504_v38 }
 0xf2f   :  { %v1577_v39 = vpop.f32.mrb[12].mxu1 }
 0xf30   :  { %v1582_v40 = vrot.slane %v1577_v39, 4  ;;  %v2685_v42 = vpop.f32.mrb[13].mxu1 }
 0xf32   :  { %v1584_v44 = vadd.f32 %v1582_v40, %v1505_v43 }
 0xf34   :  { %3000 = vtanh.f32 %v1584_v44  ;;  %v2425_v48 = vmul.f32 -1.442695, %v1584_v44 }
 0xf35   :  { %3002 = vpow2.f32 %v2424_v47 }
 0xf36   :  { %v2999_v45 = vpop.eup %2998  ;;  %3004 = vpow2.f32 %v2425_v48 }
 0xf37   :  { %1597 = vrot.lane.b32.xlu0 %v2999_v45, %s3250_s2 }
 0xf3e   :  { %v3001_v46 = vpop.eup %3000 }
 0xf3f   :  { %1624 = vrot.lane.b32.xlu1 %v3001_v46, %s3250_s2  ;;  %v3003_v49 = vpop.eup %3002 }
 0xf40   :  { %v1588_v50 = vadd.f32 1.0, %v3003_v49  ;;  %v3005_v51 = vpop.eup %3004 }
 0xf41   :  { %v1615_v52 = vadd.f32 1.0, %v3005_v51 }
 0xf42   :  { %3006 = vrcp.f32 %v1588_v50 }
 0xf43   :  { %3008 = vrcp.f32 %v1615_v52 }
 0xf4c   :  { %v3007_v53 = vpop.eup %3006 }
 0xf4d   :  { %v3009_v57 = vpop.eup %3008  ;;  %v1595_v62 = vmul.f32 %v3007_v53, %v1593_v61 }
 0xf4e   :  { %v1622_v3 = vmul.f32 %v3009_v57, %v1620_v2 }
 0xfa9   :  { %v1598_v54 = vpop.permute.xlu0 %1597 }
 0xfaa   :  { %v1600_v56 = vmul.f32 %v3007_v53, %v1598_v54 }
 0xfac   :  { %1602 = vrot.lane.b32.xlu0 %v1600_v56, %s3251_s14 }
 0xfb1   :  { %v1625_v59 = vpop.permute.xlu1 %1624 }
 0xfb2   :  { %v1627_v60 = vmul.f32 %v3009_v57, %v1625_v59 }
 0xfb4   :  { %1629 = vrot.lane.b32.xlu1 %v1627_v60, %s3251_s14 }
0x101e   :  { %v1603_v63 = vpop.permute.xlu0 %1602 }
0x101f   :  { %v3629_v1 = vadd.f32 %v1603_v63, %v1595_v62 }
0x1021   :  { %3010 = vtanh.f32 %v3629_v1  ;;  %v1817_v46 = vrot.slane %v3629_v1, 6 }
0x1026   :  { %v1630_v4 = vpop.permute.xlu1 %1629 }
0x1027   :  { %v3633_v5 = vadd.f32 %v1630_v4, %v1622_v3 }
0x1029   :  { %3012 = vtanh.f32 %v3633_v5  ;;  %v1844_v50 = vrot.slane %v3633_v5, 2 }
0x102b   :  { %v3011_v6 = vpop.eup %3010 }
0x102c   :  { %1608 = vrot.lane.b32.xlu0 %v3011_v6, %s3250_s2  ;;  %v1873_v6 = vld [vmem:[#allocation2 + $0x18] sm:$0xc0] }
0x1033   :  { %v3013_v8 = vpop.eup %3012 }
0x1034   :  { %1635 = vrot.lane.b32.xlu1 %v3013_v8, %s3250_s2 }
0x109e   :  { %v1609_v9 = vpop.permute.xlu0 %1608 }
0x109f   :  { %v3638_v11 = vmul.f32 %v3007_v53, %v1609_v9  ;;  %v1953_v9 = vld [vmem:[#allocation2 + $0x8] sm:$0x3] }
0x10a1   :  { %v1650_v12 = vrot.slane %v3638_v11, 2 }
0x10a3   :  { %1651 = vrot.lane.b32.xlu0 %v1650_v12, %s3251_s14 }
0x10a6   :  { %v1636_v13 = vpop.permute.xlu1 %1635 }
0x10a7   :  { %v3642_v14 = vmul.f32 %v3009_v57, %v1636_v13 }
0x10a9   :  { %v1730_v15 = vrot.slane %v3642_v14, 4 }
0x10ab   :  { %1731 = vrot.lane.b32.xlu1 %v1730_v15, %s3251_s14 }
0x1115   :  { %v1652_v16 = vpop.permute.xlu0 %1651 }
0x1116   :  { %2695 = vmatmul.mubr.msk.f32.vlgmr.msra.gmra.mrb[16].mxu0 %vm159_vm0, %v1652_v16 }
0x1117   :  { %2865 = vmatpush3.bf16.msra.mxu0 %v3407_v24  ;;  %2716 = vmatprep.mubr.msk.f32.mxu0 %vm3249_vm1, %v3247_v0 }
0x1118   :  { %2866 = vmatprep.subr.bf16.mxu0 %v3248_v25 }
0x111b   :  { %2868 = vmatpush3.bf16.msra.mxu0 %v3416_v32 }
0x111d   :  { %v1732_v17 = vpop.permute.xlu1 %1731 }
0x111e   :  { %2706 = vmatmul.mubr.msk.f32.vlgmr.msra.gmra.mrb[14].mxu1 %vm159_vm0, %v1732_v17 }
0x111f   :  { %2871 = vmatpush3.bf16.msra.mxu1 %v3410_v29  ;;  %2727 = vmatprep.mubr.msk.f32.mxu1 %vm3249_vm1, %v3247_v0 }
0x1120   :  { %2872 = vmatprep.subr.bf16.mxu1 %v3248_v25 }
0x1123   :  { %2874 = vmatpush3.bf16.msra.mxu1 %v3421_v33 }
0x1124   :  { %2891 = vmatprep.subr.bf16.mxu1 %v3248_v25 }
0x11e9   :  { %v1721_v24 = vpop.f32.mrb[16].mxu0 }
0x11ea   :  { %v1726_v18 = vrot.slane %v1721_v24, 4  ;;  %v2696_v19 = vpop.f32.mrb[17].mxu0 }
0x11ec   :  { %v1728_v21 = vadd.f32 %v1726_v18, %v1649_v20 }
0x11ee   :  { %3014 = vtanh.f32 %v1728_v21  ;;  %v2428_v33 = vmul.f32 -1.442695, %v1728_v21 }
0x11f1   :  { %v1801_v32 = vpop.f32.mrb[14].mxu1 }
0x11f2   :  { %v1806_v22 = vrot.slane %v1801_v32, 6  ;;  %v2707_v23 = vpop.f32.mrb[15].mxu1 }
0x11f4   :  { %v1808_v29 = vadd.f32 %v1806_v22, %v1729_v27 }
0x11f6   :  { %3016 = vtanh.f32 %v1808_v29  ;;  %v2429_v34 = vmul.f32 -1.442695, %v1808_v29 }
0x11f7   :  { %3018 = vpow2.f32 %v2428_v33 }
0x11f8   :  { %v3015_v30 = vpop.eup %3014  ;;  %3020 = vpow2.f32 %v2429_v34 }
0x11f9   :  { %1821 = vrot.lane.b32.xlu0 %v3015_v30, %s3250_s2 }
0x1200   :  { %v3017_v31 = vpop.eup %3016 }
0x1201   :  { %1848 = vrot.lane.b32.xlu1 %v3017_v31, %s3250_s2  ;;  %v3019_v35 = vpop.eup %3018 }
0x1202   :  { %v1812_v36 = vadd.f32 1.0, %v3019_v35  ;;  %v3021_v37 = vpop.eup %3020 }
0x1203   :  { %v1839_v38 = vadd.f32 1.0, %v3021_v37 }
0x1204   :  { %3022 = vrcp.f32 %v1812_v36 }
0x1205   :  { %3024 = vrcp.f32 %v1839_v38 }
0x120e   :  { %v3023_v39 = vpop.eup %3022 }
0x120f   :  { %v3025_v43 = vpop.eup %3024  ;;  %v1819_v47 = vmul.f32 %v3023_v39, %v1817_v46 }
0x1210   :  { %v1846_v51 = vmul.f32 %v3025_v43, %v1844_v50 }
0x126b   :  { %v1822_v40 = vpop.permute.xlu0 %1821 }
0x126c   :  { %v1824_v42 = vmul.f32 %v3023_v39, %v1822_v40 }
0x126e   :  { %1826 = vrot.lane.b32.xlu0 %v1824_v42, %s3251_s14 }
0x1273   :  { %v1849_v44 = vpop.permute.xlu1 %1848 }
0x1274   :  { %v1851_v45 = vmul.f32 %v3025_v43, %v1849_v44  ;;  %v2101_v44 = vld [vmem:[#allocation13 + $0x18] sm:$0xff] }
0x1276   :  { %1853 = vrot.lane.b32.xlu1 %v1851_v45, %s3251_s14  ;;  %v2188_v45 = vld [vmem:[#allocation14 + $0x8] sm:$0xff] }
0x12e0   :  { %v1827_v48 = vpop.permute.xlu0 %1826 }
0x12e1   :  { %v1829_v49 = vadd.f32 %v1827_v48, %v1819_v47 }
0x12e3   :  { %3026 = vtanh.f32 %v1829_v49  ;;  %v2038_v31 = vrot.slane %v1829_v49, 6 }
0x12e8   :  { %v1854_v52 = vpop.permute.xlu1 %1853 }
0x12e9   :  { %v1856_v53 = vadd.f32 %v1854_v52, %v1846_v51 }
0x12eb   :  { %3028 = vtanh.f32 %v1856_v53  ;;  %v2065_v36 = vrot.slane %v1856_v53, 2 }
0x12ed   :  { %v3027_v54 = vpop.eup %3026 }
0x12ee   :  { %1832 = vrot.lane.b32.xlu0 %v3027_v54, %s3250_s2 }
0x12f5   :  { %v3029_v56 = vpop.eup %3028 }
0x12f6   :  { %1859 = vrot.lane.b32.xlu1 %v3029_v56, %s3250_s2 }
0x1360   :  { %v1833_v57 = vpop.permute.xlu0 %1832 }
0x1361   :  { %v1835_v59 = vmul.f32 %v3023_v39, %v1833_v57 }
0x1363   :  { %v1874_v60 = vrot.slane %v1835_v59, 4 }
0x1365   :  { %1875 = vrot.lane.b32.xlu0 %v1874_v60, %s3251_s14 }
0x1368   :  { %v1860_v61 = vpop.permute.xlu1 %1859 }
0x1369   :  { %v1862_v62 = vmul.f32 %v3025_v43, %v1860_v61  ;;  %v2100_v43 = vld [vmem:[#allocation13 + $0x10] sm:$0xff] }
0x136a   :  { %v2189_v61 = vld [vmem:[#allocation14 + $0x10] sm:$0xff] }
0x136b   :  { %v1954_v63 = vrot.slane %v1862_v62, 2 }
0x136d   :  { %1955 = vrot.lane.b32.xlu1 %v1954_v63, %s3251_s14 }
0x13d7   :  { %v1876_v1 = vpop.permute.xlu0 %1875 }
0x13d8   :  { %2717 = vmatmul.mubr.msk.f32.vlgmr.msra.gmra.mrb[18].mxu0 %vm159_vm0, %v1876_v1 }
0x13df   :  { %v1956_v2 = vpop.permute.xlu1 %1955 }
0x13e0   :  { %2728 = vmatmul.mubr.msk.f32.vlgmr.msra.gmra.mrb[16].mxu1 %vm159_vm0, %v1956_v2 }
0x13e1   :  { %2760 = vmatprep.mubr.msk.f32.mxu1 %vm3249_vm1, %v3247_v0 }
0x14ab   :  { %v1945_v3 = vpop.f32.mrb[18].mxu0 }
0x14ac   :  { %v1950_v4 = vrot.slane %v1945_v3, 2  ;;  %v2718_v5 = vpop.f32.mrb[19].mxu0 }
0x14ae   :  { %v1952_v8 = vadd.f32 %v1950_v4, %v1873_v6  ;;  %v2297_v6 = vld [vmem:[#allocation16] sm:$0xff] }
0x14b0   :  { %3030 = vtanh.f32 %v1952_v8  ;;  %v2432_v24 = vmul.f32 -1.442695, %v1952_v8  ;;  %v2298_v8 = vld [vmem:[#allocation16 + $0x8] sm:$0xff] }
0x14b3   :  { %v2025_v12 = vpop.f32.mrb[16].mxu1 }
0x14b4   :  { %v2029_v13 = vadd.f32 %v2025_v12, %v1953_v9  ;;  %v2729_v15 = vpop.f32.mrb[17].mxu1  ;;  %v2299_v9 = vld [vmem:[#allocation16 + $0x10] sm:$0xff]  ;;  %v2892_v12 = vpack.c.bf16 %v2298_v8, %v2297_v6 }
0x14b6   :  { %3032 = vtanh.f32 %v2029_v13  ;;  %v2433_v0 = vmul.f32 -1.442695, %v2029_v13  ;;  %v2300_v13 = vld [vmem:[#allocation16 + $0x18] sm:$0xff]  ;;  %2893 = vmatpush3.bf16.msra.mxu1 %v2892_v12 }
0x14b7   :  { %3034 = vpow2.f32 %v2432_v24  ;;  %v2895_v15 = vpack.c.bf16 %v2300_v13, %v2299_v9  ;;  %2894 = vmatprep.subr.bf16.mxu1 %v3248_v25 }
0x14b8   :  { %3036 = vpow2.f32 %v2433_v0 }
0x14ba   :  { %v3031_v16 = vpop.eup %3030  ;;  %2896 = vmatpush3.bf16.msra.mxu1 %v2895_v15 }
0x14bb   :  { %2042 = vrot.lane.b32.xlu0 %v3031_v16, %s3250_s2 }
0x14c0   :  { %v3033_v17 = vpop.eup %3032 }
0x14c1   :  { %2069 = vrot.lane.b32.xlu1 %v3033_v17, %s3250_s2  ;;  %v3035_v18 = vpop.eup %3034  ;;  %v2094_v17 = vld [vmem:[#allocation2 + $0x10] sm:$0xff] }
0x14c2   :  { %v2033_v19 = vadd.f32 1.0, %v3035_v18  ;;  %v3037_v20 = vpop.eup %3036  ;;  %v2095_v18 = vld [vmem:[#allocation2 + $0x28] sm:$0xff] }
0x14c3   :  { %v2060_v21 = vadd.f32 1.0, %v3037_v20 }
0x14c4   :  { %3038 = vrcp.f32 %v2033_v19 }
0x14c5   :  { %3040 = vrcp.f32 %v2060_v21 }
0x14ce   :  { %v3039_v32 = vpop.eup %3038 }
0x14cf   :  { %v3041_v27 = vpop.eup %3040  ;;  %v2040_v33 = vmul.f32 %v3039_v32, %v2038_v31 }
0x14d0   :  { %v2067_v37 = vmul.f32 %v3041_v27, %v2065_v36 }
0x152d   :  { %v2043_v22 = vpop.permute.xlu0 %2042 }
0x152e   :  { %v2045_v23 = vmul.f32 %v3039_v32, %v2043_v22 }
0x1530   :  { %2047 = vrot.lane.b32.xlu0 %v2045_v23, %s3251_s14 }
0x1533   :  { %v2070_v29 = vpop.permute.xlu1 %2069 }
0x1534   :  { %v2072_v30 = vmul.f32 %v3041_v27, %v2070_v29 }
0x1536   :  { %2074 = vrot.lane.b32.xlu1 %v2072_v30, %s3251_s14 }
0x15a2   :  { %v2048_v34 = vpop.permute.xlu0 %2047 }
0x15a3   :  { %v2050_v35 = vadd.f32 %v2048_v34, %v2040_v33 }
0x15a5   :  { %3042 = vtanh.f32 %v2050_v35 }
0x15a8   :  { %v2075_v38 = vpop.permute.xlu1 %2074 }
0x15a9   :  { %v2077_v39 = vadd.f32 %v2075_v38, %v2067_v37  ;;  %v2438_v38 = vld [vmem:[%s3743_s8] ss:$0 sm:$0xff] }
0x15ab   :  { %3044 = vtanh.f32 %v2077_v39 }
0x15af   :  { %v3043_v40 = vpop.eup %3042 }
0x15b0   :  { %2053 = vrot.lane.b32.xlu0 %v3043_v40, %s3250_s2 }
0x15b4   :  { %754 = vrot.lane.b32.xlu0 %v3498_v7, %s3251_s14  ;;  %v2098_v7 = vld [vmem:[#allocation13] sm:$0xff] }
0x15b5   :  { %v3045_v42 = vpop.eup %3044 }
0x15b6   :  { %2080 = vrot.lane.b32.xlu1 %v3045_v42, %s3250_s2 }
0x15b8   :  { %1201 = vrot.lane.b32.xlu0 %v3570_v41, %s3251_s14 }
0x15ba   :  { %980 = vrot.lane.b32.xlu1 %v3534_v55, %s3251_s14  ;;  %v2099_v55 = vld [vmem:[#allocation13 + $0x8] sm:$0xff] }
0x15bb   :  { %v2875_v41 = vpack.c.bf16 %v2099_v55, %v2098_v7 }
0x15bc   :  { %1864 = vrot.lane.b32.xlu0 %v1835_v59, %s3251_s14 }
0x15bd   :  { %2876 = vmatprep.subr.bf16.mxu0 %v2875_v41 }
0x15be   :  { %1640 = vrot.lane.b32.xlu1 %v3638_v11, %s3251_s14  ;;  %v2879_v11 = vpack.c.bf16 %v2101_v44, %v2100_v43  ;;  %2878 = vmatpush3.bf16.msra.mxu0 %v2875_v41 }
0x15c0   :  { %1424 = vrot.lane.b32.xlu0 %v3605_v26, %s3251_s14  ;;  %2880 = vmatprep.subr.bf16.mxu0 %v2879_v11  ;;  %v2187_v26 = vld [vmem:[#allocation14] sm:$0xff] }
0x15c2   :  { %1645 = vrot.lane.b32.xlu1 %v3642_v14, %s3251_s14  ;;  %v2883_v14 = vpack.c.bf16 %v2188_v45, %v2187_v26  ;;  %2882 = vmatpush3.bf16.msra.mxu0 %v2879_v11 }
0x15c4   :  { %1869 = vrot.lane.b32.xlu0 %v1862_v62, %s3251_s14  ;;  %2884 = vmatprep.subr.bf16.mxu0 %v2883_v14  ;;  %v2190_v62 = vld [vmem:[#allocation14 + $0x18] sm:$0xff] }
0x15c5   :  { %v2887_v1 = vpack.c.bf16 %v2190_v62, %v2189_v61 }
0x15c8   :  { %537 = vrot.lane.b32.xlu0 %v3465_v28, %s3251_s14 }
0x15cc   :  { %985 = vrot.lane.b32.xlu0 %v3538_v58, %s3251_s14 }
0x1622   :  { %v2054_v46 = vpop.permute.xlu0 %2053 }
0x1623   :  { %v2056_v47 = vmul.f32 %v3039_v32, %v2054_v46 }
0x1625   :  { %2085 = vrot.lane.b32.xlu1 %v2056_v47, %s3251_s14 }
0x1626   :  { %v755_v28 = vpop.permute.xlu0 %754 }
0x1627   :  { %758 = vst.msk [vmem:[#allocation3] sm:$0xc] %vm757_vm3, %v755_v28 }
0x1628   :  { %v2081_v58 = vpop.permute.xlu1 %2080 }
0x1629   :  { %v2083_v48 = vmul.f32 %v3041_v27, %v2081_v58 }
0x162a   :  { %v1202_v49 = vpop.permute.xlu0 %1201 }
0x162b   :  { %2090 = vrot.lane.b32.xlu1 %v2083_v48, %s3251_s14  ;;  %1204 = vst.msk [vmem:[#allocation3] sm:$0xc0] %vm540_vm4, %v1202_v49 }
0x162c   :  { %v981_v50 = vpop.permute.xlu1 %980 }
0x162d   :  { %983 = vst.msk [vmem:[#allocation3] sm:$0x30] %vm763_vm5, %v981_v50 }
0x162e   :  { %v1865_v51 = vpop.permute.xlu0 %1864 }
0x162f   :  { %760 = vrot.lane.b32.xlu1 %v3502_v10, %s3251_s14  ;;  %1867 = vst.msk [vmem:[#allocation3 + $0x8] sm:$0x30] %vm763_vm5, %v1865_v51 }
0x1630   :  { %v1641_v52 = vpop.permute.xlu1 %1640 }
0x1631   :  { %1643 = vst.msk [vmem:[#allocation3 + $0x8] sm:$0xc] %vm757_vm3, %v1641_v52 }
0x1632   :  { %v1425_v53 = vpop.permute.xlu0 %1424 }
0x1633   :  { %1427 = vst.msk [vmem:[#allocation4] sm:$0xc0] %vm540_vm4, %v1425_v53 }
0x1634   :  { %v1646_v54 = vpop.permute.xlu1 %1645  ;;  %v2096_v56 = vld [vmem:[#allocation3] sm:$0xff] }
0x1635   :  { %1648 = vst.msk [vmem:[#allocation4] sm:$0x30] %vm763_vm5, %v1646_v54  ;;  %2738 = vmatprep.mubr.msk.f32.mxu0 %vm159_vm0, %v2096_v56 }
0x1636   :  { %v1870_v57 = vpop.permute.xlu0 %1869 }
0x1637   :  { %1872 = vst.msk [vmem:[#allocation4] sm:$0xc] %vm757_vm3, %v1870_v57 }
0x163a   :  { %v538_v59 = vpop.permute.xlu0 %537 }
0x163b   :  { %541 = vst.msk [vmem:[#allocation4 + $0x8] sm:$0xc0] %vm540_vm4, %v538_v59 }
0x163e   :  { %v986_v10 = vpop.permute.xlu0 %985 }
0x163f   :  { %988 = vst.msk [vmem:[#allocation4 + $0x8] sm:$0xc] %vm757_vm3, %v986_v10 }
0x1697   :  { %v2086_v60 = vpop.permute.xlu1 %2085 }
0x1698   :  { %2088 = vst.msk [vmem:[#allocation3 + $0x8] sm:$0xc0] %vm540_vm4, %v2086_v60 }
0x169d   :  { %v2091_v63 = vpop.permute.xlu1 %2090 }
0x169e   :  { %2093 = vst.msk [vmem:[#allocation4] sm:$0x3] %vm534_vm2, %v2091_v63 }
0x169f   :  { %v2097_v2 = vld [vmem:[#allocation3 + $0x8] sm:$0xff] }
0x16a0   :  { %2739 = vmatmul.mubr.msk.f32.vlgmr.msra.gmra.mrb[20].mxu0 %vm159_vm0, %v2097_v2 }
0x16a1   :  { %v761_v3 = vpop.permute.xlu1 %760  ;;  %2886 = vmatpush3.bf16.msra.mxu0 %v2883_v14 }
0x16a2   :  { %764 = vst.msk [vmem:[#allocation4 + $0x8] sm:$0x30] %vm763_vm5, %v761_v3  ;;  %2888 = vmatprep.subr.bf16.mxu0 %v2887_v1 }
0x16a5   :  { %v2185_v4 = vld [vmem:[#allocation4] sm:$0xff]  ;;  %2890 = vmatpush3.bf16.msra.mxu0 %v2887_v1 }
0x16a6   :  { %2749 = vmatprep.mubr.msk.f32.mxu0 %vm159_vm0, %v2185_v4 }
0x16a9   :  { %v2186_v5 = vld [vmem:[#allocation4 + $0x8] sm:$0xff] }
0x16aa   :  { %2750 = vmatmul.mubr.msk.f32.vlgmr.msra.gmra.mrb[20].mxu0 %vm159_vm0, %v2186_v5 }
0x177d   :  { %v2751_v16 = vpop.f32.mrb[20].mxu0 }
0x177e   :  { %v2263_v24 = vpop.f32.mrb[21].mxu0  ;;  %v2897_v19 = vadd.f32 %v2751_v16, %v2095_v18 }
0x177f   :  { %v2898_v0 = vadd.f32 %v2263_v24, %v2094_v17 }
0x1781   :  { %3046 = vtanh.f32 %v2898_v0 }
0x1782   :  { %3048 = vtanh.f32 %v2897_v19 }
0x178b   :  { %v3047_v20 = vpop.eup %3046 }
0x178c   :  { %v2277_v21 = vrot.slane %v3047_v20, 2  ;;  %v2280_v22 = vrot.slane %v3047_v20, 4  ;;  %v2283_v27 = vrot.slane %v3047_v20, 6  ;;  %v3049_v29 = vpop.eup %3048 }
0x178d   :  { %v2288_v33 = vrot.slane %v3049_v29, 2  ;;  %v2291_v34 = vrot.slane %v3049_v29, 4  ;;  %v2294_v36 = vrot.slane %v3049_v29, 6 }
0x178e   :  { %v2279_v32 = vmax.f32 %v3047_v20, %v2277_v21 }
0x1790   :  { %v2282_v23 = vmax.f32 %v2279_v32, %v2280_v22 }
0x1792   :  { %v2285_v30 = vmax.f32 %v2282_v23, %v2283_v27 }
0x1794   :  { %v2286_v31 = vmax.f32 %v2285_v30, %v3049_v29 }
0x1796   :  { %v2290_v25 = vmax.f32 %v2286_v31, %v2288_v33 }
0x1798   :  { %v2293_v35 = vmax.f32 %v2290_v25, %v2291_v34 }
0x179a   :  { %v2296_v37 = vmax.f32 %v2293_v35, %v2294_v36 }
0x179c   :  { %2761 = vmatmul.mubr.msk.f32.vlgmr.msra.gmra.mrb[18].mxu1 %vm159_vm0, %v2296_v37 }
0x186f   :  { %v2377_v39 = vpop.f32.mrb[18].mxu1 }
0x1870   :  { %v2378_v40 = vadd.f32 %v2438_v38, %v2377_v39  ;;  %v2762_v42 = vpop.f32.mrb[19].mxu1 }
0x1872   :  { %2381 = vst [vmem:[#allocation17] sm:$0x3] %v2378_v40 }
0x1873   :  { %3215 = shalt.err (!%p3212_p4)
}
0x1874   :  { %s3216_s15 = scalar_lea.hbm %s3744_s9, 32 }
0x1875   :  { %p3217_p5 = scmp.ne.s32.totalorder %s3744_s9, %s3216_s15  ;;  %p3220_p6 = scmp.lt.u32.totalorder %s3216_s15, %s3744_s9 }
0x1877   :  { %p3222_p7 = pnand %p3220_p6, %p3217_p5 }
0x1879   :  { %3225 = shalt.err (!%p3222_p7)
}
0x187a   :  { %2391 = dma.vmem_to_hbm [thread:$0]  %s2389_s11, 32, %s3744_s9, [#allocation7]  }
0x187b   :  { %3234 = dma.done.wait [#allocation7], 32  }
0x187c   :  { %3235 = vsyncadd [#allocation7], 4294967264 }
0x187d   :  { %2395 = vsyncpa [#allocation6], 1 }
0x187e   :  { %2396 = vsyncpa [#allocation9], 1 }
0x187f   :  { %2397 = vsyncpa [#allocation12], 1 }
0x1880   :  { %2398 = vsyncpa [#allocation15], 1 }
0x1881   :  { %2399 = vsyncpa [#allocation7], 1 }

</bundles_post_ra>
